<compile_context>
chip_gen: v6e
topology: v6e:2x2x1
jax: 0.10.0
libtpu: 0.0.40
codegen_flags: <defaults>
</compile_context>

<pallas_src>
import functools

import jax
import jax.numpy as jnp
import numpy as np
from jax import lax
from jax.experimental import pallas as pl
from jax.experimental.pallas import tpu as pltpu  # noqa: F401  (harness convention)


# ------------------------------ fused kernel ---------------------------------
def _fused_forward_kernel(ids_ref, wslab_ref, vslab_ref, hc0_ref, out_ref,
                          *, T, B, H, V, L):
    G = 4 * H
    WO = out_ref.shape[1]

    # static row offsets inside the packed weight slab
    r_whh0 = V
    r_wcat = V + H
    r_fc1 = r_wcat + 2 * H * (L - 1)
    r_fc2 = r_fc1 + H
    rb_fc1 = 2 + (L - 1)
    rb_fc2 = rb_fc1 + 1

    # ---- embedding gather fused with the layer-0 input projection ----
    # wslab rows [0:V) hold E_proj = emb @ (0.5-folded W_ih0) + (0.5-folded b0),
    # so one one-hot MXU matmul yields the whole-sequence layer-0 gate
    # pre-activations, bias included.
    ids = ids_ref[...]                                              # (T*B, 1) int32, time-major
    onehot = (ids == lax.broadcasted_iota(jnp.int32, (T * B, V), 1)
              ).astype(jnp.float32)                                 # (T*B, V)
    xproj0 = jnp.dot(onehot, wslab_ref[0:V, :],
                     preferred_element_type=jnp.float32)            # (T*B, 4H)

    # ---- hoisted constants (loaded / broadcast once, reused every step) ----
    # Only the post-tanh affine remains (i/f/o: 0.5*t+0.5 ; g: t), expressed as
    # one full-width multiply-add with precomputed scale/offset rows.
    sc1 = jnp.broadcast_to(vslab_ref[0:1, :], (B, G))
    of1 = jnp.broadcast_to(vslab_ref[1:2, :], (B, G))

    def cell(gates, c_prev, sc, of):
        t = jnp.tanh(gates)                 # single lane-dense EUP pass over all gates
        a = t * sc + of                     # i/f/o -> sigmoid, g -> tanh
        i = a[:, 0 * H:1 * H]
        f = a[:, 1 * H:2 * H]
        g = a[:, 2 * H:3 * H]
        o = a[:, 3 * H:4 * H]
        c = f * c_prev + i * g
        h = o * jnp.tanh(c)
        return h, c

    hs = [hc0_ref[l] for l in range(L)]
    cs = [hc0_ref[L + l] for l in range(L)]

    if L == 2:
        # ---- diagonal wavefront: layer0@t and layer1@(t-1) in the same step ----
        whh0 = wslab_ref[r_whh0:r_whh0 + H, :]                      # (H, 4H)
        wcat1 = wslab_ref[r_wcat:r_wcat + 2 * H, :]                 # (2H, 4H)
        wcomb = wslab_ref[r_whh0:r_whh0 + 3 * H, :]                 # (3H, 4H) = [Whh0; Wih1; Whh1]
        b1 = jnp.broadcast_to(vslab_ref[2:3, :], (B, G))
        sc2 = jnp.broadcast_to(vslab_ref[0:1, :], (2 * B, G))
        of2 = jnp.broadcast_to(vslab_ref[1:2, :], (2 * B, G))
        zH = jnp.zeros((B, H), jnp.float32)
        z2H = jnp.zeros((B, 2 * H), jnp.float32)

        # ramp-up: layer 0, t = 0
        g0 = xproj0[0:B, :] + jnp.dot(hs[0], whh0,
                                      preferred_element_type=jnp.float32)
        hs[0], cs[0] = cell(g0, cs[0], sc1, of1)

        # steady state: layer0 @ t=s together with layer1 @ t=s-1
        for s in range(1, T):
            x_top = jnp.concatenate([hs[0], z2H], axis=1)           # (B, 3H)
            x_bot = jnp.concatenate([zH, hs[0], hs[1]], axis=1)     # (B, 3H)
            x2 = jnp.concatenate([x_top, x_bot], axis=0)            # (2B, 3H)
            bias2 = jnp.concatenate([xproj0[s * B:(s + 1) * B, :], b1], axis=0)
            gates = jnp.dot(x2, wcomb,
                            preferred_element_type=jnp.float32) + bias2
            c_prev = jnp.concatenate([cs[0], cs[1]], axis=0)        # (2B, H)
            h2, c2 = cell(gates, c_prev, sc2, of2)
            hs[0], hs[1] = h2[0:B, :], h2[B:2 * B, :]
            cs[0], cs[1] = c2[0:B, :], c2[B:2 * B, :]

        # ramp-down: layer 1, t = T-1
        xh = jnp.concatenate([hs[0], hs[1]], axis=1)                # (B, 2H)
        g1 = jnp.dot(xh, wcat1, preferred_element_type=jnp.float32) + b1
        hs[1], cs[1] = cell(g1, cs[1], sc1, of1)
    else:
        # generic layer-serial fallback (weights / bias broadcasts hoisted)
        whh0 = wslab_ref[r_whh0:r_whh0 + H, :]
        wcats = [wslab_ref[r_wcat + 2 * H * (l - 1):r_wcat + 2 * H * l, :]
                 for l in range(1, L)]
        bls = [jnp.broadcast_to(vslab_ref[2 + l - 1:2 + l, :], (B, G))
               for l in range(1, L)]
        for t in range(T):
            g0 = xproj0[t * B:(t + 1) * B, :] + jnp.dot(
                hs[0], whh0, preferred_element_type=jnp.float32)
            hs[0], cs[0] = cell(g0, cs[0], sc1, of1)
            for l in range(1, L):
                xh = jnp.concatenate([hs[l - 1], hs[l]], axis=1)
                gl = jnp.dot(xh, wcats[l - 1],
                             preferred_element_type=jnp.float32) + bls[l - 1]
                hs[l], cs[l] = cell(gl, cs[l], sc1, of1)

    # ---- head: out[:, -1] -> ReLU -> fc1 -> dropout(identity) -> fc2 ----
    # fc weights are zero-padded to 128 lanes at prep time so everything stays
    # lane-dense (padding lanes carry exact zeros through both matmuls).
    rel = jnp.maximum(hs[L - 1], 0.0)                               # (B, H)
    d1 = jnp.dot(rel, wslab_ref[r_fc1:r_fc1 + H, :],
                 preferred_element_type=jnp.float32) + vslab_ref[rb_fc1:rb_fc1 + 1, :]
    preds = jnp.dot(d1, wslab_ref[r_fc2:r_fc2 + G, :],
                    preferred_element_type=jnp.float32) + vslab_ref[rb_fc2:rb_fc2 + 1, :]

    # ---- single lane-dense output slab, written once ----
    def pad_lanes(x):
        if x.shape[1] == WO:
            return x
        return jnp.concatenate(
            [x, jnp.zeros((x.shape[0], WO - x.shape[1]), jnp.float32)], axis=1)

    hc = jnp.concatenate(hs + cs, axis=1)                           # (B, 2*L*H)
    out_ref[...] = jnp.concatenate([pad_lanes(hc), pad_lanes(preds)], axis=0)


# --------------------------- one-time param packing ---------------------------
def prepare_params(params):
    """Runs ONCE: folds the sigmoid 0.5 scale into weights/biases, fuses the
    embedding with the layer-0 input projection, and packs everything into two
    lane-dense f32 slabs."""
    emb = jnp.asarray(params["embedding"], jnp.float32)             # (V, E)
    lstm = params["lstm"]
    V, _E = emb.shape
    H = lstm[0][1].shape[0]
    L = len(lstm)
    G = 4 * H
    fc1_w = jnp.asarray(params["fc1_w"], jnp.float32)
    fc1_b = jnp.asarray(params["fc1_b"], jnp.float32).reshape(1, -1)
    fc2_w = jnp.asarray(params["fc2_w"], jnp.float32)
    fc2_b = jnp.asarray(params["fc2_b"], jnp.float32).reshape(1, -1)
    DH = fc1_w.shape[1]
    O = fc2_w.shape[1]
    # TODO(synk): tile the fc head if hidden_dim / num_classes ever exceed 4*lstm_units lanes.
    assert DH <= G and O <= G

    col = jnp.arange(G)
    is_g = (col >= 2 * H) & (col < 3 * H)
    # sigmoid(x) = 0.5*tanh(0.5*x) + 0.5 : fold the 0.5 input scale into the
    # i/f/o columns of every LSTM weight AND bias (exact power-of-two scaling).
    fold = jnp.where(is_g, 1.0, 0.5)[None, :].astype(jnp.float32)

    w_ih0, w_hh0, b0 = lstm[0]
    eproj = (emb @ (jnp.asarray(w_ih0, jnp.float32) * fold)
             + jnp.asarray(b0, jnp.float32).reshape(1, -1) * fold)  # (V, 4H)
    blocks = [eproj, jnp.asarray(w_hh0, jnp.float32) * fold]
    brows = []
    for (w_ih, w_hh, b) in lstm[1:]:
        blocks.append(jnp.concatenate([jnp.asarray(w_ih, jnp.float32),
                                       jnp.asarray(w_hh, jnp.float32)], axis=0) * fold)
        brows.append(jnp.asarray(b, jnp.float32).reshape(1, -1) * fold)
    blocks.append(jnp.zeros((H, G), jnp.float32).at[:, :DH].set(fc1_w))
    blocks.append(jnp.zeros((G, G), jnp.float32).at[:DH, :O].set(fc2_w))
    wslab = jnp.concatenate(blocks, axis=0)                         # (V+H+2H(L-1)+H+4H, 4H)

    sc = jnp.where(is_g, 1.0, 0.5)[None, :].astype(jnp.float32)     # post-tanh scale
    of = jnp.where(is_g, 0.0, 0.5)[None, :].astype(jnp.float32)     # post-tanh offset
    vrows = [sc, of] + brows
    vrows.append(jnp.zeros((1, G), jnp.float32).at[:, :DH].set(fc1_b))
    vrows.append(jnp.zeros((1, G), jnp.float32).at[:, :O].set(fc2_b))
    vslab = jnp.concatenate(vrows, axis=0)                          # (2+(L-1)+2, 4H)

    prep = {"wslab": wslab, "vslab": vslab}
    meta = (V, H, L, DH, O)
    return prep, meta


# --------------------------------- forward -----------------------------------
@functools.partial(jax.jit, static_argnums=(3,))
def forward(prep, x_ids, hidden, meta):
    """x_ids: (B, T) int32 token ids. hidden: (h0, c0) each (num_layers, B, H)."""
    V, H, L, DH, O = meta
    h0, c0 = hidden
    B, T = x_ids.shape
    G = 4 * H
    WO = max(G, 2 * L * H)

    ids_tm = jnp.transpose(x_ids, (1, 0)).reshape(T * B, 1).astype(jnp.int32)
    hc0 = jnp.concatenate([h0, c0], axis=0).astype(jnp.float32)     # (2L, B, H)

    kernel = functools.partial(_fused_forward_kernel, T=T, B=B, H=H, V=V, L=L)
    slab = pl.pallas_call(
        kernel,
        out_shape=jax.ShapeDtypeStruct((2 * B, WO), jnp.float32),
    )(ids_tm, prep["wslab"], prep["vslab"], hc0)

    preds = slab[B:2 * B, :O]
    hc = slab[0:B, :2 * L * H].reshape(B, 2 * L, H)
    h_n = jnp.transpose(hc[:, :L, :], (1, 0, 2))
    c_n = jnp.transpose(hc[:, L:, :], (1, 0, 2))
    return preds, (h_n, c_n)


# --------------------------- pure-JAX reference -------------------------------
def reference(params, x_ids, hidden):
    h_all, c_all = hidden
    seq = jnp.take(params["embedding"], x_ids, axis=0)              # (B, T, E)
    hs, cs = [], []
    for l, (w_ih, w_hh, b) in enumerate(params["lstm"]):
        h, c = h_all[l], c_all[l]
        H = h.shape[-1]
        outs = []
        for t in range(seq.shape[1]):
            gates = seq[:, t] @ w_ih + h @ w_hh + b
            i = jax.nn.sigmoid(gates[:, :H])
            f = jax.nn.sigmoid(gates[:, H:2 * H])
            g = jnp.tanh(gates[:, 2 * H:3 * H])
            o = jax.nn.sigmoid(gates[:, 3 * H:])
            c = f * c + i * g
            h = o * jnp.tanh(c)
            outs.append(h)
        seq = jnp.stack(outs, axis=1)
        hs.append(h)
        cs.append(c)
    last = seq[:, -1]
    d1 = jnp.maximum(last, 0.0) @ params["fc1_w"] + params["fc1_b"]
    preds = d1 @ params["fc2_w"] + params["fc2_b"]
    return preds, (jnp.stack(hs), jnp.stack(cs))


# ----------------------------------- main -------------------------------------
if __name__ == "__main__":
    vocab_size, embedding_dim, lstm_units, hidden_dim = 32, 16, 32, 32
    num_layers = 2
    B, T = 2, 8

    key = jax.random.PRNGKey(0)
    k_in, k_emb, k_lstm, k_fc1, k_fc2 = jax.random.split(key, 5)

    # Deterministic synthetic parameters (not a checkpoint load).
    emb = 0.1 * jax.random.normal(k_emb, (vocab_size, embedding_dim), jnp.float32)
    emb = emb.at[0].set(0.0)                                        # padding_idx=0

    lstm_params = []
    ks = jax.random.split(k_lstm, num_layers * 3)
    for l in range(num_layers):
        in_dim = embedding_dim if l == 0 else lstm_units
        w_ih = 0.1 * jax.random.normal(ks[3 * l + 0], (in_dim, 4 * lstm_units), jnp.float32)
        w_hh = 0.1 * jax.random.normal(ks[3 * l + 1], (lstm_units, 4 * lstm_units), jnp.float32)
        b = 0.1 * jax.random.normal(ks[3 * l + 2], (1, 4 * lstm_units), jnp.float32)  # b_ih + b_hh
        lstm_params.append((w_ih, w_hh, b))

    params = {
        "embedding": emb,
        "lstm": lstm_params,
        "fc1_w": 0.1 * jax.random.normal(k_fc1, (lstm_units, hidden_dim), jnp.float32),
        "fc1_b": jnp.zeros((1, hidden_dim), jnp.float32),
        "fc2_w": 0.1 * jax.random.normal(k_fc2, (hidden_dim, 3), jnp.float32),
        "fc2_b": jnp.zeros((1, 3), jnp.float32),
    }

    x_ids = jax.random.randint(k_in, (B, T), 0, vocab_size, dtype=jnp.int32)
    hidden0 = (jnp.zeros((num_layers, B, lstm_units), jnp.float32),
               jnp.zeros((num_layers, B, lstm_units), jnp.float32))

    # One-time packing (hoisted out of the per-call path per the perf review).
    prep, meta = prepare_params(params)

    preds, (h_n, c_n) = forward(prep, x_ids, hidden0, meta)
    preds = jax.block_until_ready(preds)
    h_n = jax.block_until_ready(h_n)
    c_n = jax.block_until_ready(c_n)

    preds_ref, (h_ref, c_ref) = reference(params, x_ids, hidden0)
    np.testing.assert_allclose(np.asarray(preds), np.asarray(preds_ref), rtol=1e-5, atol=1e-5)
    np.testing.assert_allclose(np.asarray(h_n), np.asarray(h_ref), rtol=1e-5, atol=1e-5)
    np.testing.assert_allclose(np.asarray(c_n), np.asarray(c_ref), rtol=1e-5, atol=1e-5)

    print("KERNEL_OK")
</pallas_src>

<mosaic_0001>
module attributes {stable_mosaic.version = 11 : i64} {
  func.func @_fused_forward_kernel(%arg0: memref<16x1xi32, #tpu.memory_space<vmem>>, %arg1: memref<288x128xf32, #tpu.memory_space<vmem>>, %arg2: memref<5x128xf32, #tpu.memory_space<vmem>>, %arg3: memref<4x2x32xf32, #tpu.memory_space<vmem>>, %arg4: memref<4x128xf32, #tpu.memory_space<vmem>>) attributes {dimension_semantics = [], scalar_prefetch = 0 : i64, scratch_operands = 0 : i64, tpu.core_type = #tpu.core_type<tc>} {
    %c0 = arith.constant 0 : index
    %c0_0 = arith.constant 0 : index
    %0 = vector.load %arg0[%c0, %c0_0] : memref<16x1xi32, #tpu.memory_space<vmem>>, vector<16x1xi32>
    %1 = tpu.iota {dimensions = array<i32: 1>} : vector<16x32xi32>
    %2 = vector.broadcast %0 : vector<16x1xi32> to vector<16x32xi32>
    %3 = arith.cmpi eq, %2, %1 : vector<16x32xi32>
    %4 = arith.extui %3 : vector<16x32xi1> to vector<16x32xi32>
    %5 = arith.sitofp %4 : vector<16x32xi32> to vector<16x32xf32>
    %c0_1 = arith.constant 0 : index
    %c0_2 = arith.constant 0 : index
    %6 = vector.load %arg1[%c0_1, %c0_2] : memref<288x128xf32, #tpu.memory_space<vmem>>, vector<32x128xf32>
    %cst = arith.constant dense<0.000000e+00> : vector<16x128xf32>
    %7 = tpu.matmul %5, %6, %cst {dimension_numbers = #tpu.dot_dimension_numbers<[1], [0], [0], [1], [0, 0, 1, 1], [], []>} : vector<16x32xf32>, vector<32x128xf32>, vector<16x128xf32> -> vector<16x128xf32>
    %c0_3 = arith.constant 0 : index
    %c0_4 = arith.constant 0 : index
    %8 = vector.load %arg2[%c0_3, %c0_4] : memref<5x128xf32, #tpu.memory_space<vmem>>, vector<1x128xf32>
    %9 = vector.shape_cast %8 : vector<1x128xf32> to vector<1x128xf32>
    %10 = vector.broadcast %9 : vector<1x128xf32> to vector<2x128xf32>
    %c1 = arith.constant 1 : index
    %c0_5 = arith.constant 0 : index
    %11 = vector.load %arg2[%c1, %c0_5] : memref<5x128xf32, #tpu.memory_space<vmem>>, vector<1x128xf32>
    %12 = vector.shape_cast %11 : vector<1x128xf32> to vector<1x128xf32>
    %13 = vector.broadcast %12 : vector<1x128xf32> to vector<2x128xf32>
    %c0_6 = arith.constant 0 : index
    %c0_7 = arith.constant 0 : index
    %c0_8 = arith.constant 0 : index
    %14 = vector.load %arg3[%c0_6, %c0_7, %c0_8] : memref<4x2x32xf32, #tpu.memory_space<vmem>>, vector<1x2x32xf32>
    %15 = vector.shape_cast %14 : vector<1x2x32xf32> to vector<2x32xf32>
    %c1_9 = arith.constant 1 : index
    %c0_10 = arith.constant 0 : index
    %c0_11 = arith.constant 0 : index
    %16 = vector.load %arg3[%c1_9, %c0_10, %c0_11] : memref<4x2x32xf32, #tpu.memory_space<vmem>>, vector<1x2x32xf32>
    %17 = vector.shape_cast %16 : vector<1x2x32xf32> to vector<2x32xf32>
    %c2 = arith.constant 2 : index
    %c0_12 = arith.constant 0 : index
    %c0_13 = arith.constant 0 : index
    %18 = vector.load %arg3[%c2, %c0_12, %c0_13] : memref<4x2x32xf32, #tpu.memory_space<vmem>>, vector<1x2x32xf32>
    %19 = vector.shape_cast %18 : vector<1x2x32xf32> to vector<2x32xf32>
    %c3 = arith.constant 3 : index
    %c0_14 = arith.constant 0 : index
    %c0_15 = arith.constant 0 : index
    %20 = vector.load %arg3[%c3, %c0_14, %c0_15] : memref<4x2x32xf32, #tpu.memory_space<vmem>>, vector<1x2x32xf32>
    %21 = vector.shape_cast %20 : vector<1x2x32xf32> to vector<2x32xf32>
    %c32 = arith.constant 32 : index
    %c0_16 = arith.constant 0 : index
    %22 = vector.load %arg1[%c32, %c0_16] : memref<288x128xf32, #tpu.memory_space<vmem>>, vector<32x128xf32>
    %c64 = arith.constant 64 : index
    %c0_17 = arith.constant 0 : index
    %23 = vector.load %arg1[%c64, %c0_17] : memref<288x128xf32, #tpu.memory_space<vmem>>, vector<64x128xf32>
    %c32_18 = arith.constant 32 : index
    %c0_19 = arith.constant 0 : index
    %24 = vector.load %arg1[%c32_18, %c0_19] : memref<288x128xf32, #tpu.memory_space<vmem>>, vector<96x128xf32>
    %c2_20 = arith.constant 2 : index
    %c0_21 = arith.constant 0 : index
    %25 = vector.load %arg2[%c2_20, %c0_21] : memref<5x128xf32, #tpu.memory_space<vmem>>, vector<1x128xf32>
    %26 = vector.shape_cast %25 : vector<1x128xf32> to vector<1x128xf32>
    %27 = vector.broadcast %26 : vector<1x128xf32> to vector<2x128xf32>
    %c0_22 = arith.constant 0 : index
    %c0_23 = arith.constant 0 : index
    %28 = vector.load %arg2[%c0_22, %c0_23] : memref<5x128xf32, #tpu.memory_space<vmem>>, vector<1x128xf32>
    %29 = vector.shape_cast %28 : vector<1x128xf32> to vector<1x128xf32>
    %30 = vector.broadcast %29 : vector<1x128xf32> to vector<4x128xf32>
    %c1_24 = arith.constant 1 : index
    %c0_25 = arith.constant 0 : index
    %31 = vector.load %arg2[%c1_24, %c0_25] : memref<5x128xf32, #tpu.memory_space<vmem>>, vector<1x128xf32>
    %32 = vector.shape_cast %31 : vector<1x128xf32> to vector<1x128xf32>
    %33 = vector.broadcast %32 : vector<1x128xf32> to vector<4x128xf32>
    %cst_26 = arith.constant 0.000000e+00 : f32
    %34 = vector.broadcast %cst_26 : f32 to vector<2x32xf32>
    %cst_27 = arith.constant 0.000000e+00 : f32
    %35 = vector.broadcast %cst_27 : f32 to vector<2x64xf32>
    %36 = vector.extract_strided_slice %7 {offsets = [0, 0], sizes = [2, 128], strides = [1, 1]} : vector<16x128xf32> to vector<2x128xf32>
    %cst_28 = arith.constant dense<0.000000e+00> : vector<2x128xf32>
    %37 = tpu.matmul %15, %22, %cst_28 {dimension_numbers = #tpu.dot_dimension_numbers<[1], [0], [0], [1], [0, 0, 1, 1], [], []>} : vector<2x32xf32>, vector<32x128xf32>, vector<2x128xf32> -> vector<2x128xf32>
    %38 = arith.addf %36, %37 : vector<2x128xf32>
    %39 = math.tanh %38 : vector<2x128xf32>
    %40 = arith.mulf %39, %10 : vector<2x128xf32>
    %41 = arith.addf %40, %13 : vector<2x128xf32>
    %42 = vector.extract_strided_slice %41 {offsets = [0, 0], sizes = [2, 32], strides = [1, 1]} : vector<2x128xf32> to vector<2x32xf32>
    %43 = vector.extract_strided_slice %41 {offsets = [0, 32], sizes = [2, 32], strides = [1, 1]} : vector<2x128xf32> to vector<2x32xf32>
    %44 = vector.extract_strided_slice %41 {offsets = [0, 64], sizes = [2, 32], strides = [1, 1]} : vector<2x128xf32> to vector<2x32xf32>
    %45 = vector.extract_strided_slice %41 {offsets = [0, 96], sizes = [2, 32], strides = [1, 1]} : vector<2x128xf32> to vector<2x32xf32>
    %46 = arith.mulf %43, %19 : vector<2x32xf32>
    %47 = arith.mulf %42, %44 : vector<2x32xf32>
    %48 = arith.addf %46, %47 : vector<2x32xf32>
    %49 = math.tanh %48 : vector<2x32xf32>
    %50 = arith.mulf %45, %49 : vector<2x32xf32>
    %51 = tpu.concatenate %50, %35 in 1 : vector<2x32xf32>, vector<2x64xf32> -> vector<2x96xf32>
    %52 = tpu.concatenate %34, %50, %17 in 1 : vector<2x32xf32>, vector<2x32xf32>, vector<2x32xf32> -> vector<2x96xf32>
    %53 = tpu.concatenate %51, %52 in 0 : vector<2x96xf32>, vector<2x96xf32> -> vector<4x96xf32>
    %54 = vector.extract_strided_slice %7 {offsets = [2, 0], sizes = [2, 128], strides = [1, 1]} : vector<16x128xf32> to vector<2x128xf32>
    %55 = tpu.concatenate %54, %27 in 0 : vector<2x128xf32>, vector<2x128xf32> -> vector<4x128xf32>
    %cst_29 = arith.constant dense<0.000000e+00> : vector<4x128xf32>
    %56 = tpu.matmul %53, %24, %cst_29 {dimension_numbers = #tpu.dot_dimension_numbers<[1], [0], [0], [1], [0, 0, 1, 1], [], []>} : vector<4x96xf32>, vector<96x128xf32>, vector<4x128xf32> -> vector<4x128xf32>
    %57 = arith.addf %56, %55 : vector<4x128xf32>
    %58 = tpu.concatenate %48, %21 in 0 : vector<2x32xf32>, vector<2x32xf32> -> vector<4x32xf32>
    %59 = math.tanh %57 : vector<4x128xf32>
    %60 = arith.mulf %59, %30 : vector<4x128xf32>
    %61 = arith.addf %60, %33 : vector<4x128xf32>
    %62 = vector.extract_strided_slice %61 {offsets = [0, 0], sizes = [4, 32], strides = [1, 1]} : vector<4x128xf32> to vector<4x32xf32>
    %63 = vector.extract_strided_slice %61 {offsets = [0, 32], sizes = [4, 32], strides = [1, 1]} : vector<4x128xf32> to vector<4x32xf32>
    %64 = vector.extract_strided_slice %61 {offsets = [0, 64], sizes = [4, 32], strides = [1, 1]} : vector<4x128xf32> to vector<4x32xf32>
    %65 = vector.extract_strided_slice %61 {offsets = [0, 96], sizes = [4, 32], strides = [1, 1]} : vector<4x128xf32> to vector<4x32xf32>
    %66 = arith.mulf %63, %58 : vector<4x32xf32>
    %67 = arith.mulf %62, %64 : vector<4x32xf32>
    %68 = arith.addf %66, %67 : vector<4x32xf32>
    %69 = math.tanh %68 : vector<4x32xf32>
    %70 = arith.mulf %65, %69 : vector<4x32xf32>
    %71 = vector.extract_strided_slice %70 {offsets = [0, 0], sizes = [2, 32], strides = [1, 1]} : vector<4x32xf32> to vector<2x32xf32>
    %72 = vector.extract_strided_slice %70 {offsets = [2, 0], sizes = [2, 32], strides = [1, 1]} : vector<4x32xf32> to vector<2x32xf32>
    %73 = vector.extract_strided_slice %68 {offsets = [0, 0], sizes = [2, 32], strides = [1, 1]} : vector<4x32xf32> to vector<2x32xf32>
    %74 = vector.extract_strided_slice %68 {offsets = [2, 0], sizes = [2, 32], strides = [1, 1]} : vector<4x32xf32> to vector<2x32xf32>
    %75 = tpu.concatenate %71, %35 in 1 : vector<2x32xf32>, vector<2x64xf32> -> vector<2x96xf32>
    %76 = tpu.concatenate %34, %71, %72 in 1 : vector<2x32xf32>, vector<2x32xf32>, vector<2x32xf32> -> vector<2x96xf32>
    %77 = tpu.concatenate %75, %76 in 0 : vector<2x96xf32>, vector<2x96xf32> -> vector<4x96xf32>
    %78 = vector.extract_strided_slice %7 {offsets = [4, 0], sizes = [2, 128], strides = [1, 1]} : vector<16x128xf32> to vector<2x128xf32>
    %79 = tpu.concatenate %78, %27 in 0 : vector<2x128xf32>, vector<2x128xf32> -> vector<4x128xf32>
    %cst_30 = arith.constant dense<0.000000e+00> : vector<4x128xf32>
    %80 = tpu.matmul %77, %24, %cst_30 {dimension_numbers = #tpu.dot_dimension_numbers<[1], [0], [0], [1], [0, 0, 1, 1], [], []>} : vector<4x96xf32>, vector<96x128xf32>, vector<4x128xf32> -> vector<4x128xf32>
    %81 = arith.addf %80, %79 : vector<4x128xf32>
    %82 = tpu.concatenate %73, %74 in 0 : vector<2x32xf32>, vector<2x32xf32> -> vector<4x32xf32>
    %83 = math.tanh %81 : vector<4x128xf32>
    %84 = arith.mulf %83, %30 : vector<4x128xf32>
    %85 = arith.addf %84, %33 : vector<4x128xf32>
    %86 = vector.extract_strided_slice %85 {offsets = [0, 0], sizes = [4, 32], strides = [1, 1]} : vector<4x128xf32> to vector<4x32xf32>
    %87 = vector.extract_strided_slice %85 {offsets = [0, 32], sizes = [4, 32], strides = [1, 1]} : vector<4x128xf32> to vector<4x32xf32>
    %88 = vector.extract_strided_slice %85 {offsets = [0, 64], sizes = [4, 32], strides = [1, 1]} : vector<4x128xf32> to vector<4x32xf32>
    %89 = vector.extract_strided_slice %85 {offsets = [0, 96], sizes = [4, 32], strides = [1, 1]} : vector<4x128xf32> to vector<4x32xf32>
    %90 = arith.mulf %87, %82 : vector<4x32xf32>
    %91 = arith.mulf %86, %88 : vector<4x32xf32>
    %92 = arith.addf %90, %91 : vector<4x32xf32>
    %93 = math.tanh %92 : vector<4x32xf32>
    %94 = arith.mulf %89, %93 : vector<4x32xf32>
    %95 = vector.extract_strided_slice %94 {offsets = [0, 0], sizes = [2, 32], strides = [1, 1]} : vector<4x32xf32> to vector<2x32xf32>
    %96 = vector.extract_strided_slice %94 {offsets = [2, 0], sizes = [2, 32], strides = [1, 1]} : vector<4x32xf32> to vector<2x32xf32>
    %97 = vector.extract_strided_slice %92 {offsets = [0, 0], sizes = [2, 32], strides = [1, 1]} : vector<4x32xf32> to vector<2x32xf32>
    %98 = vector.extract_strided_slice %92 {offsets = [2, 0], sizes = [2, 32], strides = [1, 1]} : vector<4x32xf32> to vector<2x32xf32>
    %99 = tpu.concatenate %95, %35 in 1 : vector<2x32xf32>, vector<2x64xf32> -> vector<2x96xf32>
    %100 = tpu.concatenate %34, %95, %96 in 1 : vector<2x32xf32>, vector<2x32xf32>, vector<2x32xf32> -> vector<2x96xf32>
    %101 = tpu.concatenate %99, %100 in 0 : vector<2x96xf32>, vector<2x96xf32> -> vector<4x96xf32>
    %102 = vector.extract_strided_slice %7 {offsets = [6, 0], sizes = [2, 128], strides = [1, 1]} : vector<16x128xf32> to vector<2x128xf32>
    %103 = tpu.concatenate %102, %27 in 0 : vector<2x128xf32>, vector<2x128xf32> -> vector<4x128xf32>
    %cst_31 = arith.constant dense<0.000000e+00> : vector<4x128xf32>
    %104 = tpu.matmul %101, %24, %cst_31 {dimension_numbers = #tpu.dot_dimension_numbers<[1], [0], [0], [1], [0, 0, 1, 1], [], []>} : vector<4x96xf32>, vector<96x128xf32>, vector<4x128xf32> -> vector<4x128xf32>
    %105 = arith.addf %104, %103 : vector<4x128xf32>
    %106 = tpu.concatenate %97, %98 in 0 : vector<2x32xf32>, vector<2x32xf32> -> vector<4x32xf32>
    %107 = math.tanh %105 : vector<4x128xf32>
    %108 = arith.mulf %107, %30 : vector<4x128xf32>
    %109 = arith.addf %108, %33 : vector<4x128xf32>
    %110 = vector.extract_strided_slice %109 {offsets = [0, 0], sizes = [4, 32], strides = [1, 1]} : vector<4x128xf32> to vector<4x32xf32>
    %111 = vector.extract_strided_slice %109 {offsets = [0, 32], sizes = [4, 32], strides = [1, 1]} : vector<4x128xf32> to vector<4x32xf32>
    %112 = vector.extract_strided_slice %109 {offsets = [0, 64], sizes = [4, 32], strides = [1, 1]} : vector<4x128xf32> to vector<4x32xf32>
    %113 = vector.extract_strided_slice %109 {offsets = [0, 96], sizes = [4, 32], strides = [1, 1]} : vector<4x128xf32> to vector<4x32xf32>
    %114 = arith.mulf %111, %106 : vector<4x32xf32>
    %115 = arith.mulf %110, %112 : vector<4x32xf32>
    %116 = arith.addf %114, %115 : vector<4x32xf32>
    %117 = math.tanh %116 : vector<4x32xf32>
    %118 = arith.mulf %113, %117 : vector<4x32xf32>
    %119 = vector.extract_strided_slice %118 {offsets = [0, 0], sizes = [2, 32], strides = [1, 1]} : vector<4x32xf32> to vector<2x32xf32>
    %120 = vector.extract_strided_slice %118 {offsets = [2, 0], sizes = [2, 32], strides = [1, 1]} : vector<4x32xf32> to vector<2x32xf32>
    %121 = vector.extract_strided_slice %116 {offsets = [0, 0], sizes = [2, 32], strides = [1, 1]} : vector<4x32xf32> to vector<2x32xf32>
    %122 = vector.extract_strided_slice %116 {offsets = [2, 0], sizes = [2, 32], strides = [1, 1]} : vector<4x32xf32> to vector<2x32xf32>
    %123 = tpu.concatenate %119, %35 in 1 : vector<2x32xf32>, vector<2x64xf32> -> vector<2x96xf32>
    %124 = tpu.concatenate %34, %119, %120 in 1 : vector<2x32xf32>, vector<2x32xf32>, vector<2x32xf32> -> vector<2x96xf32>
    %125 = tpu.concatenate %123, %124 in 0 : vector<2x96xf32>, vector<2x96xf32> -> vector<4x96xf32>
    %126 = vector.extract_strided_slice %7 {offsets = [8, 0], sizes = [2, 128], strides = [1, 1]} : vector<16x128xf32> to vector<2x128xf32>
    %127 = tpu.concatenate %126, %27 in 0 : vector<2x128xf32>, vector<2x128xf32> -> vector<4x128xf32>
    %cst_32 = arith.constant dense<0.000000e+00> : vector<4x128xf32>
    %128 = tpu.matmul %125, %24, %cst_32 {dimension_numbers = #tpu.dot_dimension_numbers<[1], [0], [0], [1], [0, 0, 1, 1], [], []>} : vector<4x96xf32>, vector<96x128xf32>, vector<4x128xf32> -> vector<4x128xf32>
    %129 = arith.addf %128, %127 : vector<4x128xf32>
    %130 = tpu.concatenate %121, %122 in 0 : vector<2x32xf32>, vector<2x32xf32> -> vector<4x32xf32>
    %131 = math.tanh %129 : vector<4x128xf32>
    %132 = arith.mulf %131, %30 : vector<4x128xf32>
    %133 = arith.addf %132, %33 : vector<4x128xf32>
    %134 = vector.extract_strided_slice %133 {offsets = [0, 0], sizes = [4, 32], strides = [1, 1]} : vector<4x128xf32> to vector<4x32xf32>
    %135 = vector.extract_strided_slice %133 {offsets = [0, 32], sizes = [4, 32], strides = [1, 1]} : vector<4x128xf32> to vector<4x32xf32>
    %136 = vector.extract_strided_slice %133 {offsets = [0, 64], sizes = [4, 32], strides = [1, 1]} : vector<4x128xf32> to vector<4x32xf32>
    %137 = vector.extract_strided_slice %133 {offsets = [0, 96], sizes = [4, 32], strides = [1, 1]} : vector<4x128xf32> to vector<4x32xf32>
    %138 = arith.mulf %135, %130 : vector<4x32xf32>
    %139 = arith.mulf %134, %136 : vector<4x32xf32>
    %140 = arith.addf %138, %139 : vector<4x32xf32>
    %141 = math.tanh %140 : vector<4x32xf32>
    %142 = arith.mulf %137, %141 : vector<4x32xf32>
    %143 = vector.extract_strided_slice %142 {offsets = [0, 0], sizes = [2, 32], strides = [1, 1]} : vector<4x32xf32> to vector<2x32xf32>
    %144 = vector.extract_strided_slice %142 {offsets = [2, 0], sizes = [2, 32], strides = [1, 1]} : vector<4x32xf32> to vector<2x32xf32>
    %145 = vector.extract_strided_slice %140 {offsets = [0, 0], sizes = [2, 32], strides = [1, 1]} : vector<4x32xf32> to vector<2x32xf32>
    %146 = vector.extract_strided_slice %140 {offsets = [2, 0], sizes = [2, 32], strides = [1, 1]} : vector<4x32xf32> to vector<2x32xf32>
    %147 = tpu.concatenate %143, %35 in 1 : vector<2x32xf32>, vector<2x64xf32> -> vector<2x96xf32>
    %148 = tpu.concatenate %34, %143, %144 in 1 : vector<2x32xf32>, vector<2x32xf32>, vector<2x32xf32> -> vector<2x96xf32>
    %149 = tpu.concatenate %147, %148 in 0 : vector<2x96xf32>, vector<2x96xf32> -> vector<4x96xf32>
    %150 = vector.extract_strided_slice %7 {offsets = [10, 0], sizes = [2, 128], strides = [1, 1]} : vector<16x128xf32> to vector<2x128xf32>
    %151 = tpu.concatenate %150, %27 in 0 : vector<2x128xf32>, vector<2x128xf32> -> vector<4x128xf32>
    %cst_33 = arith.constant dense<0.000000e+00> : vector<4x128xf32>
    %152 = tpu.matmul %149, %24, %cst_33 {dimension_numbers = #tpu.dot_dimension_numbers<[1], [0], [0], [1], [0, 0, 1, 1], [], []>} : vector<4x96xf32>, vector<96x128xf32>, vector<4x128xf32> -> vector<4x128xf32>
    %153 = arith.addf %152, %151 : vector<4x128xf32>
    %154 = tpu.concatenate %145, %146 in 0 : vector<2x32xf32>, vector<2x32xf32> -> vector<4x32xf32>
    %155 = math.tanh %153 : vector<4x128xf32>
    %156 = arith.mulf %155, %30 : vector<4x128xf32>
    %157 = arith.addf %156, %33 : vector<4x128xf32>
    %158 = vector.extract_strided_slice %157 {offsets = [0, 0], sizes = [4, 32], strides = [1, 1]} : vector<4x128xf32> to vector<4x32xf32>
    %159 = vector.extract_strided_slice %157 {offsets = [0, 32], sizes = [4, 32], strides = [1, 1]} : vector<4x128xf32> to vector<4x32xf32>
    %160 = vector.extract_strided_slice %157 {offsets = [0, 64], sizes = [4, 32], strides = [1, 1]} : vector<4x128xf32> to vector<4x32xf32>
    %161 = vector.extract_strided_slice %157 {offsets = [0, 96], sizes = [4, 32], strides = [1, 1]} : vector<4x128xf32> to vector<4x32xf32>
    %162 = arith.mulf %159, %154 : vector<4x32xf32>
    %163 = arith.mulf %158, %160 : vector<4x32xf32>
    %164 = arith.addf %162, %163 : vector<4x32xf32>
    %165 = math.tanh %164 : vector<4x32xf32>
    %166 = arith.mulf %161, %165 : vector<4x32xf32>
    %167 = vector.extract_strided_slice %166 {offsets = [0, 0], sizes = [2, 32], strides = [1, 1]} : vector<4x32xf32> to vector<2x32xf32>
    %168 = vector.extract_strided_slice %166 {offsets = [2, 0], sizes = [2, 32], strides = [1, 1]} : vector<4x32xf32> to vector<2x32xf32>
    %169 = vector.extract_strided_slice %164 {offsets = [0, 0], sizes = [2, 32], strides = [1, 1]} : vector<4x32xf32> to vector<2x32xf32>
    %170 = vector.extract_strided_slice %164 {offsets = [2, 0], sizes = [2, 32], strides = [1, 1]} : vector<4x32xf32> to vector<2x32xf32>
    %171 = tpu.concatenate %167, %35 in 1 : vector<2x32xf32>, vector<2x64xf32> -> vector<2x96xf32>
    %172 = tpu.concatenate %34, %167, %168 in 1 : vector<2x32xf32>, vector<2x32xf32>, vector<2x32xf32> -> vector<2x96xf32>
    %173 = tpu.concatenate %171, %172 in 0 : vector<2x96xf32>, vector<2x96xf32> -> vector<4x96xf32>
    %174 = vector.extract_strided_slice %7 {offsets = [12, 0], sizes = [2, 128], strides = [1, 1]} : vector<16x128xf32> to vector<2x128xf32>
    %175 = tpu.concatenate %174, %27 in 0 : vector<2x128xf32>, vector<2x128xf32> -> vector<4x128xf32>
    %cst_34 = arith.constant dense<0.000000e+00> : vector<4x128xf32>
    %176 = tpu.matmul %173, %24, %cst_34 {dimension_numbers = #tpu.dot_dimension_numbers<[1], [0], [0], [1], [0, 0, 1, 1], [], []>} : vector<4x96xf32>, vector<96x128xf32>, vector<4x128xf32> -> vector<4x128xf32>
    %177 = arith.addf %176, %175 : vector<4x128xf32>
    %178 = tpu.concatenate %169, %170 in 0 : vector<2x32xf32>, vector<2x32xf32> -> vector<4x32xf32>
    %179 = math.tanh %177 : vector<4x128xf32>
    %180 = arith.mulf %179, %30 : vector<4x128xf32>
    %181 = arith.addf %180, %33 : vector<4x128xf32>
    %182 = vector.extract_strided_slice %181 {offsets = [0, 0], sizes = [4, 32], strides = [1, 1]} : vector<4x128xf32> to vector<4x32xf32>
    %183 = vector.extract_strided_slice %181 {offsets = [0, 32], sizes = [4, 32], strides = [1, 1]} : vector<4x128xf32> to vector<4x32xf32>
    %184 = vector.extract_strided_slice %181 {offsets = [0, 64], sizes = [4, 32], strides = [1, 1]} : vector<4x128xf32> to vector<4x32xf32>
    %185 = vector.extract_strided_slice %181 {offsets = [0, 96], sizes = [4, 32], strides = [1, 1]} : vector<4x128xf32> to vector<4x32xf32>
    %186 = arith.mulf %183, %178 : vector<4x32xf32>
    %187 = arith.mulf %182, %184 : vector<4x32xf32>
    %188 = arith.addf %186, %187 : vector<4x32xf32>
    %189 = math.tanh %188 : vector<4x32xf32>
    %190 = arith.mulf %185, %189 : vector<4x32xf32>
    %191 = vector.extract_strided_slice %190 {offsets = [0, 0], sizes = [2, 32], strides = [1, 1]} : vector<4x32xf32> to vector<2x32xf32>
    %192 = vector.extract_strided_slice %190 {offsets = [2, 0], sizes = [2, 32], strides = [1, 1]} : vector<4x32xf32> to vector<2x32xf32>
    %193 = vector.extract_strided_slice %188 {offsets = [0, 0], sizes = [2, 32], strides = [1, 1]} : vector<4x32xf32> to vector<2x32xf32>
    %194 = vector.extract_strided_slice %188 {offsets = [2, 0], sizes = [2, 32], strides = [1, 1]} : vector<4x32xf32> to vector<2x32xf32>
    %195 = tpu.concatenate %191, %35 in 1 : vector<2x32xf32>, vector<2x64xf32> -> vector<2x96xf32>
    %196 = tpu.concatenate %34, %191, %192 in 1 : vector<2x32xf32>, vector<2x32xf32>, vector<2x32xf32> -> vector<2x96xf32>
    %197 = tpu.concatenate %195, %196 in 0 : vector<2x96xf32>, vector<2x96xf32> -> vector<4x96xf32>
    %198 = vector.extract_strided_slice %7 {offsets = [14, 0], sizes = [2, 128], strides = [1, 1]} : vector<16x128xf32> to vector<2x128xf32>
    %199 = tpu.concatenate %198, %27 in 0 : vector<2x128xf32>, vector<2x128xf32> -> vector<4x128xf32>
    %cst_35 = arith.constant dense<0.000000e+00> : vector<4x128xf32>
    %200 = tpu.matmul %197, %24, %cst_35 {dimension_numbers = #tpu.dot_dimension_numbers<[1], [0], [0], [1], [0, 0, 1, 1], [], []>} : vector<4x96xf32>, vector<96x128xf32>, vector<4x128xf32> -> vector<4x128xf32>
    %201 = arith.addf %200, %199 : vector<4x128xf32>
    %202 = tpu.concatenate %193, %194 in 0 : vector<2x32xf32>, vector<2x32xf32> -> vector<4x32xf32>
    %203 = math.tanh %201 : vector<4x128xf32>
    %204 = arith.mulf %203, %30 : vector<4x128xf32>
    %205 = arith.addf %204, %33 : vector<4x128xf32>
    %206 = vector.extract_strided_slice %205 {offsets = [0, 0], sizes = [4, 32], strides = [1, 1]} : vector<4x128xf32> to vector<4x32xf32>
    %207 = vector.extract_strided_slice %205 {offsets = [0, 32], sizes = [4, 32], strides = [1, 1]} : vector<4x128xf32> to vector<4x32xf32>
    %208 = vector.extract_strided_slice %205 {offsets = [0, 64], sizes = [4, 32], strides = [1, 1]} : vector<4x128xf32> to vector<4x32xf32>
    %209 = vector.extract_strided_slice %205 {offsets = [0, 96], sizes = [4, 32], strides = [1, 1]} : vector<4x128xf32> to vector<4x32xf32>
    %210 = arith.mulf %207, %202 : vector<4x32xf32>
    %211 = arith.mulf %206, %208 : vector<4x32xf32>
    %212 = arith.addf %210, %211 : vector<4x32xf32>
    %213 = math.tanh %212 : vector<4x32xf32>
    %214 = arith.mulf %209, %213 : vector<4x32xf32>
    %215 = vector.extract_strided_slice %214 {offsets = [0, 0], sizes = [2, 32], strides = [1, 1]} : vector<4x32xf32> to vector<2x32xf32>
    %216 = vector.extract_strided_slice %214 {offsets = [2, 0], sizes = [2, 32], strides = [1, 1]} : vector<4x32xf32> to vector<2x32xf32>
    %217 = vector.extract_strided_slice %212 {offsets = [0, 0], sizes = [2, 32], strides = [1, 1]} : vector<4x32xf32> to vector<2x32xf32>
    %218 = vector.extract_strided_slice %212 {offsets = [2, 0], sizes = [2, 32], strides = [1, 1]} : vector<4x32xf32> to vector<2x32xf32>
    %219 = tpu.concatenate %215, %216 in 1 : vector<2x32xf32>, vector<2x32xf32> -> vector<2x64xf32>
    %cst_36 = arith.constant dense<0.000000e+00> : vector<2x128xf32>
    %220 = tpu.matmul %219, %23, %cst_36 {dimension_numbers = #tpu.dot_dimension_numbers<[1], [0], [0], [1], [0, 0, 1, 1], [], []>} : vector<2x64xf32>, vector<64x128xf32>, vector<2x128xf32> -> vector<2x128xf32>
    %221 = arith.addf %220, %27 : vector<2x128xf32>
    %222 = math.tanh %221 : vector<2x128xf32>
    %223 = arith.mulf %222, %10 : vector<2x128xf32>
    %224 = arith.addf %223, %13 : vector<2x128xf32>
    %225 = vector.extract_strided_slice %224 {offsets = [0, 0], sizes = [2, 32], strides = [1, 1]} : vector<2x128xf32> to vector<2x32xf32>
    %226 = vector.extract_strided_slice %224 {offsets = [0, 32], sizes = [2, 32], strides = [1, 1]} : vector<2x128xf32> to vector<2x32xf32>
    %227 = vector.extract_strided_slice %224 {offsets = [0, 64], sizes = [2, 32], strides = [1, 1]} : vector<2x128xf32> to vector<2x32xf32>
    %228 = vector.extract_strided_slice %224 {offsets = [0, 96], sizes = [2, 32], strides = [1, 1]} : vector<2x128xf32> to vector<2x32xf32>
    %229 = arith.mulf %226, %218 : vector<2x32xf32>
    %230 = arith.mulf %225, %227 : vector<2x32xf32>
    %231 = arith.addf %229, %230 : vector<2x32xf32>
    %232 = math.tanh %231 : vector<2x32xf32>
    %233 = arith.mulf %228, %232 : vector<2x32xf32>
    %cst_37 = arith.constant 0.000000e+00 : f32
    %234 = vector.broadcast %cst_37 : f32 to vector<2x32xf32>
    %235 = arith.maximumf %233, %234 : vector<2x32xf32>
    %c128 = arith.constant 128 : index
    %c0_38 = arith.constant 0 : index
    %236 = vector.load %arg1[%c128, %c0_38] : memref<288x128xf32, #tpu.memory_space<vmem>>, vector<32x128xf32>
    %cst_39 = arith.constant dense<0.000000e+00> : vector<2x128xf32>
    %237 = tpu.matmul %235, %236, %cst_39 {dimension_numbers = #tpu.dot_dimension_numbers<[1], [0], [0], [1], [0, 0, 1, 1], [], []>} : vector<2x32xf32>, vector<32x128xf32>, vector<2x128xf32> -> vector<2x128xf32>
    %c3_40 = arith.constant 3 : index
    %c0_41 = arith.constant 0 : index
    %238 = vector.load %arg2[%c3_40, %c0_41] : memref<5x128xf32, #tpu.memory_space<vmem>>, vector<1x128xf32>
    %239 = vector.broadcast %238 : vector<1x128xf32> to vector<2x128xf32>
    %240 = arith.addf %237, %239 : vector<2x128xf32>
    %c160 = arith.constant 160 : index
    %c0_42 = arith.constant 0 : index
    %241 = vector.load %arg1[%c160, %c0_42] : memref<288x128xf32, #tpu.memory_space<vmem>>, vector<128x128xf32>
    %cst_43 = arith.constant dense<0.000000e+00> : vector<2x128xf32>
    %242 = tpu.matmul %240, %241, %cst_43 {dimension_numbers = #tpu.dot_dimension_numbers<[1], [0], [0], [1], [0, 0, 1, 1], [], []>} : vector<2x128xf32>, vector<128x128xf32>, vector<2x128xf32> -> vector<2x128xf32>
    %c4 = arith.constant 4 : index
    %c0_44 = arith.constant 0 : index
    %243 = vector.load %arg2[%c4, %c0_44] : memref<5x128xf32, #tpu.memory_space<vmem>>, vector<1x128xf32>
    %244 = vector.broadcast %243 : vector<1x128xf32> to vector<2x128xf32>
    %245 = arith.addf %242, %244 : vector<2x128xf32>
    %246 = tpu.concatenate %215, %233, %217, %231 in 1 : vector<2x32xf32>, vector<2x32xf32>, vector<2x32xf32>, vector<2x32xf32> -> vector<2x128xf32>
    %247 = tpu.concatenate %246, %245 in 0 : vector<2x128xf32>, vector<2x128xf32> -> vector<4x128xf32>
    %c0_45 = arith.constant 0 : index
    %c0_46 = arith.constant 0 : index
    %248 = vector.load %arg4[%c0_45, %c0_46] : memref<4x128xf32, #tpu.memory_space<vmem>>, vector<4x128xf32>
    tpu.vector_store %arg4[%c0_45, %c0_46], %247 {strides = array<i32>} : memref<4x128xf32, #tpu.memory_space<vmem>>, vector<4x128xf32>,
    return
  }
}

</mosaic_0001>

<bundles_post_ra>
// kernel: forward.1
= control target key start
LH: loop header
LB: loop body
LE: loop exit
PB: predicated region body
PF: predicated region fallthrough
CT: control target
= control target key end

     0   :  { %9 = vsyncpa [#allocation3], 0  ;;  %s1876_s15 = smov [#allocation2]   ;;  %s2381_s0 = inlined_call_operand.vmem [shape: s32[16,1], index: 0, kind: input, shape index: {}]   ;;  %s2382_s1 = inlined_call_operand.hbm [shape: f32[288,128], index: 1, kind: input, shape index: {}]   ;;  %s2383_s2 = inlined_call_operand.vmem [shape: f32[5,128], index: 2, kind: input, shape index: {}]   ;;  %s2384_s3 = inlined_call_operand.vmem [shape: f32[4,2,32], index: 3, kind: input, shape index: {}]   ;;  %s2385_s4 = inlined_call_operand.vmem [shape: f32[4,128], index: 4, kind: output, shape index: {}]  }
   0x1   :  { %s17_s16 = sshll.u32 %s1876_s15, 4  ;;  %s18_s16 = int_to_ptr.vmem [resolvable:$true] %s17_s16 }
   0x2   :  { %s1862_s17 = scalar_lea.vmem %s18_s16, 4608  ;;  %p1867_p1 = scmp.lt.s32.totalorder %s18_s16, %s18_s16 }
   0x3   :  { %p1863_p0 = scmp.ne.s32.totalorder %s18_s16, %s1862_s17  ;;  %p1868_p2 = scmp.lt.s32.totalorder %s1862_s17, %s1862_s17 }
   0x5   :  { %p1869_p3 = por %p1868_p2, %p1867_p1 }
   0x7   :  { %p1870_p4 = pnand %p1869_p3, %p1863_p0 }
   0x9   :  { %1873 = shalt.err (!%p1870_p4)
}
   0xa   :  { %s1877_s18 = smov 128   ;;  %s1878_s19 = smov 8  }
   0xb   :  { %23 = dma.hbm_to_vmem [thread:$0]  %s2382_s1, 4608, %s18_s16, [#allocation3], %s1877_s18, %s1877_s18, %s1878_s19  }
   0xc   :  { %1874 = dma.done.wait [#allocation3], 4608  }
   0xd   :  { %1875 = vsyncadd [#allocation3], 4294962688  ;;  %v1879_v0 = vmov 0   ;;  %v1880_v1 = vmov 0.0   ;;  %v31_v2 = vld [vmem:[%s2381_s0] sm:$0xff]  ;;  %v50_v3 = vld [vmem:[#allocation2 + $0x18] sm:$0xff]  ;;  %v33_v8 = vlaneseq }
   0xe   :  { %1817 = vset.pattern.permute.xlu0 %v1879_v0  ;;  %1554 = vmatprep.subr.mxu0 %v1880_v1  ;;  %v49_v4 = vld [vmem:[#allocation2 + $0x10] sm:$0xff]  ;;  %v32_v5 = vld [vmem:[%s2381_s0 + $0x8] sm:$0xff]  ;;  %v47_v7 = vld [vmem:[#allocation2] sm:$0xff]  ;;  %vm1881_vm0 = vmmov 0   ;;  %vm51_vm1 = vcmask 261120   ;;  %s1882_s30 = smov 64  }
   0xf   :  { %36 = vperm.xlu0 %1817, %v31_v2   ;;  %1532 = vmatprep.subr.mxu1 %v50_v3  ;;  %v48_v6 = vld [vmem:[#allocation2 + $0x8] sm:$0xff]  ;;  %v34_v9 = vand.u32 127, %v33_v8  ;;  %v1925_v13 = vld [vmem:[#allocation2 + $0x38] sm:$0xff]  ;;  %v1929_v15 = vld [vmem:[#allocation2 + $0x30] sm:$0xff]  ;;  %s1883_s7 = smov 32   ;;  %vm278_vm4 = vcmask 523264  }
  0x10   :  { %1533 = vmatpush3.msra.mxu1 %v50_v3  ;;  %1578 = vmatprep.mubr.msk.f32.mxu0 %vm1881_vm0, %v1880_v1  ;;  %v1935_v16 = vld [vmem:[#allocation2 + $0x28] sm:$0xff]  ;;  %v1939_v17 = vld [vmem:[#allocation2 + $0x20] sm:$0xff]  ;;  %v1982_v36 = vld [vmem:[#allocation2 + $0x78] sm:$0xff]  ;;  %vm289_vm5 = vcmask 785408   ;;  %vm283_vm6 = vcmask 1041408   ;;  %s1884_s13 = smov 96  }
  0x11   :  { %1534 = vmatprep.subr.mxu1 %v49_v4  ;;  %v143_v18 = vld [vmem:[%s2384_s3] sm:$0x3]  ;;  %v1384_v29 = vld [vmem:[%s2384_s3 + $0x4] sm:$0x3]  ;;  %v1984_v37 = vld [vmem:[#allocation2 + $0x70] sm:$0xff]  ;;  %1555 = vmatpush3.msra.mxu0 %v1982_v36 }
  0x12   :  { %1535 = vmatpush3.msra.mxu1 %v49_v4  ;;  %v1959_v24 = vld [vmem:[%s2383_s2] ss:$0 sm:$0xff]  ;;  %v1964_v26 = vld [vmem:[%s2383_s2 + $0x1] ss:$0 sm:$0xff]  ;;  %1556 = vmatprep.subr.mxu0 %v1880_v1  ;;  %v1989_v39 = vld [vmem:[#allocation2 + $0x68] sm:$0xff] }
  0x13   :  { %39 = vperm.xlu0 %1817, %v32_v5   ;;  %1536 = vmatprep.subr.mxu1 %v48_v6  ;;  %v1383_v40 = vld [vmem:[%s2384_s3 + $0x2] sm:$0x3]  ;;  %v2004_v42 = vld [vmem:[#allocation2 + $0x58] sm:$0xff]  ;;  %v2010_v43 = vld [vmem:[#allocation2 + $0x50] sm:$0xff] }
  0x14   :  { %1537 = vmatpush3.msra.mxu1 %v48_v6  ;;  %1557 = vmatpush3.msra.mxu0 %v1984_v37  ;;  %v1998_v41 = vld [vmem:[#allocation2 + $0x60] sm:$0xff]  ;;  %v2016_v44 = vld [vmem:[#allocation2 + $0x48] sm:$0xff] }
  0x15   :  { %1538 = vmatprep.subr.mxu1 %v47_v7  ;;  %1558 = vmatprep.subr.mxu0 %v1880_v1  ;;  %v2022_v45 = vld [vmem:[#allocation2 + $0x40] sm:$0xff] }
  0x16   :  { %1539 = vmatpush3.msra.mxu1 %v47_v7  ;;  %1559 = vmatpush3.msra.mxu0 %v1989_v39  ;;  %v1385_v48 = vld [vmem:[%s2384_s3 + $0x6] sm:$0x3]  ;;  %v2093_v59 = vld [vmem:[%s2383_s2 + $0x2] ss:$0 sm:$0xff] }
  0x17   :  { %1543 = vmatprep.subr.mxu1 %v1880_v1  ;;  %1560 = vmatprep.subr.mxu0 %v1880_v1  ;;  %v364_v49 = vrot.slane %v1385_v48, 6 }
  0x18   :  { %1561 = vmatpush3.msra.mxu0 %v1998_v41 }
  0x19   :  { %1562 = vmatprep.subr.mxu0 %v1880_v1 }
  0x1a   :  { %1563 = vmatpush3.msra.mxu0 %v2004_v42 }
  0x1b   :  { %1564 = vmatprep.subr.mxu0 %v1880_v1 }
  0x1c   :  { %1565 = vmatpush3.msra.mxu0 %v2010_v43 }
  0x1d   :  { %1566 = vmatprep.subr.mxu0 %v1880_v1 }
  0x1e   :  { %1567 = vmatpush3.msra.mxu0 %v2016_v44 }
  0x1f   :  { %1568 = vmatprep.subr.mxu0 %v1880_v1 }
  0x20   :  { %1569 = vmatpush3.msra.mxu0 %v2022_v45 }
  0x21   :  { %1570 = vmatprep.subr.mxu0 %v1880_v1 }
  0x22   :  { %1571 = vmatpush3.msra.mxu0 %v1925_v13 }
  0x23   :  { %1572 = vmatprep.subr.mxu0 %v1880_v1 }
  0x24   :  { %1573 = vmatpush3.msra.mxu0 %v1929_v15 }
  0x25   :  { %1574 = vmatprep.subr.mxu0 %v1880_v1 }
  0x26   :  { %1575 = vmatpush3.msra.mxu0 %v1935_v16 }
  0x27   :  { %1576 = vmatprep.subr.mxu0 %v1880_v1 }
  0x28   :  { %1577 = vmatpush3.msra.mxu0 %v1939_v17 }
  0x29   :  { %1608 = vmatprep.subr.mxu0 %v1880_v1 }
  0x8a   :  { %v37_v10 = vpop.permute.xlu0 %36 }
  0x8b   :  { %vm41_vm2 = vcmp.eq.s32.totalorder %v37_v10, %v34_v9 }
  0x8c   :  { %v1377_v11 = vsel %vm41_vm2, 1.0, %v1880_v1 }
  0x8d   :  { %1540 = vmatprep.mubr.msk.f32.mxu1 %vm51_vm1, %v1377_v11 }
  0x8e   :  { %v40_v12 = vpop.permute.xlu0 %39 }
  0x8f   :  { %vm42_vm3 = vcmp.eq.s32.totalorder %v40_v12, %v34_v9 }
  0x90   :  { %v1378_v14 = vsel %vm42_vm3, 1.0, %v1880_v1 }
  0x91   :  { %1541 = vmatmul.mubr.msk.f32.vlgmr.msra.gmra.mxu1 %vm51_vm1, %v1378_v14 }
  0x92   :  { %1544 = vmatpush3.msra.mxu1 %v1925_v13  ;;  %1551 = vmatprep.mubr.msk.f32.mxu1 %vm1881_vm0, %v1880_v1 }
  0x93   :  { %1545 = vmatprep.subr.mxu1 %v1880_v1 }
  0x94   :  { %1546 = vmatpush3.msra.mxu1 %v1929_v15 }
  0x95   :  { %1547 = vmatprep.subr.mxu1 %v1880_v1 }
  0x96   :  { %1548 = vmatpush3.msra.mxu1 %v1935_v16 }
  0x97   :  { %1549 = vmatprep.subr.mxu1 %v1880_v1 }
  0x98   :  { %1550 = vmatpush3.msra.mxu1 %v1939_v17 }
  0x99   :  { %1552 = vmatmul.mubr.msk.f32.vlgmr.msra.gmra.mxu1 %vm51_vm1, %v143_v18  ;;  %1581 = vmatprep.subr.mxu1 %v1880_v1 }
  0x9a   :  { %1605 = vmatprep.mubr.msk.f32.mxu1 %vm1881_vm0, %v1880_v1  ;;  %1582 = vmatpush3.msra.mxu1 %v1982_v36 }
  0x9b   :  { %1583 = vmatprep.subr.mxu1 %v1880_v1 }
  0x9c   :  { %1584 = vmatpush3.msra.mxu1 %v1984_v37 }
  0x9d   :  { %1585 = vmatprep.subr.mxu1 %v1880_v1 }
  0x9e   :  { %1586 = vmatpush3.msra.mxu1 %v1989_v39 }
  0x9f   :  { %1587 = vmatprep.subr.mxu1 %v1880_v1 }
  0xa0   :  { %1588 = vmatpush3.msra.mxu1 %v1998_v41 }
  0xa1   :  { %1589 = vmatprep.subr.mxu1 %v1880_v1 }
  0xa2   :  { %1590 = vmatpush3.msra.mxu1 %v2004_v42 }
  0xa3   :  { %1591 = vmatprep.subr.mxu1 %v1880_v1 }
  0xa4   :  { %1592 = vmatpush3.msra.mxu1 %v2010_v43 }
  0xa5   :  { %1593 = vmatprep.subr.mxu1 %v1880_v1 }
  0xa6   :  { %1594 = vmatpush3.msra.mxu1 %v2016_v44 }
  0xa7   :  { %1595 = vmatprep.subr.mxu1 %v1880_v1 }
  0xa8   :  { %1596 = vmatpush3.msra.mxu1 %v2022_v45 }
  0xa9   :  { %1597 = vmatprep.subr.mxu1 %v1880_v1 }
  0xaa   :  { %1598 = vmatpush3.msra.mxu1 %v1925_v13 }
  0xab   :  { %1599 = vmatprep.subr.mxu1 %v1880_v1 }
  0xac   :  { %1600 = vmatpush3.msra.mxu1 %v1929_v15 }
  0xad   :  { %1601 = vmatprep.subr.mxu1 %v1880_v1 }
  0xae   :  { %1602 = vmatpush3.msra.mxu1 %v1935_v16 }
  0xaf   :  { %1603 = vmatprep.subr.mxu1 %v1880_v1 }
  0xb0   :  { %1604 = vmatpush3.msra.mxu1 %v1939_v17 }
  0xb1   :  { %1635 = vmatprep.subr.mxu1 %v1880_v1 }
 0x151   :  { %v1951_v19 = vpop.f32.mrf.mxu1 }
 0x153   :  { %v1953_v20 = vpop.f32.mrf.mxu1 }
 0x154   :  { %v286_v58 = vrot.slane %v1953_v20, 2 }
 0x156   :  { %v288_v60 = vsel %vm283_vm6, %v286_v58, %v2093_v59 }
 0x159   :  { %v236_v21 = vpop.f32.mrf.mxu1 }
 0x15a   :  { %v240_v22 = vadd.f32 %v236_v21, %v1953_v20 }
 0x15b   :  { %v1553_v23 = vpop.f32.mrf.mxu1 }
 0x15c   :  { %1818 = vtanh.f32 %v240_v22 }
 0x169   :  { %v1819_v25 = vpop.eup %1818 }
 0x16a   :  { %v242_v27 = vmul.f32 %v1819_v25, %v1959_v24 }
 0x16c   :  { %v1968_v28 = vadd.f32 %v1964_v26, %v242_v27 }
 0x16e   :  { %250 = vrot.lane.b32.xlu1 %v1968_v28, %s1882_s30 }
 0x172   :  { %245 = vrot.lane.b32.xlu1 %v1384_v29, %s1883_s7 }
 0x1e0   :  { %v251_v30 = vpop.permute.xlu1 %250 }
 0x1e1   :  { %v253_v31 = vmul.f32 %v251_v30, %v1968_v28 }
 0x1e3   :  { %255 = vrot.lane.b32.xlu0 %v253_v31, %s1883_s7  ;;  %v407_v31 = vrot.slane %v1953_v20, 4 }
 0x1e4   :  { %v246_v32 = vpop.permute.xlu1 %245 }
 0x1e5   :  { %v248_v33 = vmul.f32 %v246_v32, %v1968_v28  ;;  %v409_v32 = vsel %vm283_vm6, %v407_v31, %v2093_v59 }
 0x255   :  { %v256_v34 = vpop.permute.xlu0 %255 }
 0x256   :  { %v1979_v35 = vadd.f32 %v256_v34, %v248_v33 }
 0x258   :  { %1820 = vtanh.f32 %v1979_v35 }
 0x265   :  { %v1821_v38 = vpop.eup %1820 }
 0x266   :  { %261 = vrot.lane.b32.xlu1 %v1821_v38, %s1882_s30 }
 0x26a   :  { %274 = vrot.lane.b32.xlu1 %v1383_v40, %s1882_s30 }
 0x2d8   :  { %v262_v46 = vpop.permute.xlu1 %261 }
 0x2d9   :  { %v264_v47 = vmul.f32 %v262_v46, %v1968_v28 }
 0x2db   :  { %270 = vrot.lane.b32.xlu0 %v264_v47, %s1882_s30 }
 0x2dc   :  { %v275_v50 = vpop.permute.xlu1 %274 }
 0x2df   :  { %266 = vrot.lane.b32.xlu0 %v264_v47, %s1883_s7 }
 0x2e3   :  { %365 = vrot.lane.b32.xlu0 %v364_v49, %s1883_s7 }
 0x34d   :  { %v271_v51 = vpop.permute.xlu0 %270 }
 0x34e   :  { %v277_v52 = vsel %vm51_vm1, 0.0, %v271_v51 }
 0x34f   :  { %v279_v53 = vsel %vm278_vm4, %v277_v52, %v275_v50 }
 0x350   :  { %v281_v54 = vrot.slane %v279_v53, 6 }
 0x351   :  { %v267_v55 = vpop.permute.xlu0 %266 }
 0x352   :  { %v269_v56 = vsel %vm51_vm1, %v267_v55, 0.0 }
 0x353   :  { %v284_v57 = vsel %vm283_vm6, %v269_v56, %v281_v54 }
 0x354   :  { %1579 = vmatmul.mubr.msk.f32.vlgmr.msra.gmra.mxu0 %vm289_vm5, %v284_v57 }
 0x355   :  { %1609 = vmatpush3.msra.mxu0 %v1982_v36  ;;  %1632 = vmatprep.mubr.msk.f32.mxu0 %vm1881_vm0, %v1880_v1  ;;  %v366_v6 = vpop.permute.xlu0 %365 }
 0x356   :  { %1610 = vmatprep.subr.mxu0 %v1880_v1  ;;  %v368_v7 = vsel %vm283_vm6, %v1979_v35, %v366_v6 }
 0x357   :  { %1611 = vmatpush3.msra.mxu0 %v1984_v37 }
 0x358   :  { %1612 = vmatprep.subr.mxu0 %v1880_v1 }
 0x359   :  { %1613 = vmatpush3.msra.mxu0 %v1989_v39 }
 0x35a   :  { %1614 = vmatprep.subr.mxu0 %v1880_v1 }
 0x35b   :  { %1615 = vmatpush3.msra.mxu0 %v1998_v41 }
 0x35c   :  { %1616 = vmatprep.subr.mxu0 %v1880_v1 }
 0x35d   :  { %1617 = vmatpush3.msra.mxu0 %v2004_v42 }
 0x35e   :  { %1618 = vmatprep.subr.mxu0 %v1880_v1 }
 0x35f   :  { %1619 = vmatpush3.msra.mxu0 %v2010_v43 }
 0x360   :  { %1620 = vmatprep.subr.mxu0 %v1880_v1 }
 0x361   :  { %1621 = vmatpush3.msra.mxu0 %v2016_v44 }
 0x362   :  { %1622 = vmatprep.subr.mxu0 %v1880_v1 }
 0x363   :  { %1623 = vmatpush3.msra.mxu0 %v2022_v45 }
 0x364   :  { %1624 = vmatprep.subr.mxu0 %v1880_v1 }
 0x365   :  { %1625 = vmatpush3.msra.mxu0 %v1925_v13 }
 0x366   :  { %1626 = vmatprep.subr.mxu0 %v1880_v1 }
 0x367   :  { %1627 = vmatpush3.msra.mxu0 %v1929_v15 }
 0x368   :  { %1628 = vmatprep.subr.mxu0 %v1880_v1 }
 0x369   :  { %1629 = vmatpush3.msra.mxu0 %v1935_v16 }
 0x36a   :  { %1630 = vmatprep.subr.mxu0 %v1880_v1 }
 0x36b   :  { %1631 = vmatpush3.msra.mxu0 %v1939_v17 }
 0x36c   :  { %1662 = vmatprep.subr.mxu0 %v1880_v1 }
 0x414   :  { %v359_v61 = vpop.f32.mrf.mxu0 }
 0x415   :  { %v360_v62 = vadd.f32 %v359_v61, %v288_v60 }
 0x416   :  { %v1580_v63 = vpop.f32.mrf.mxu0 }
 0x417   :  { %1822 = vtanh.f32 %v360_v62 }
 0x424   :  { %v1823_v0 = vpop.eup %1822 }
 0x425   :  { %v370_v2 = vmul.f32 %v1823_v0, %v1959_v24 }
 0x427   :  { %v371_v3 = vadd.f32 %v1964_v26, %v370_v2  ;;  %v521_v2 = vrot.slane %v1953_v20, 6 }
 0x429   :  { %374 = vrot.lane.b32.xlu1 %v371_v3, %s1882_s30  ;;  %v372_v8 = vmul.f32 %v371_v3, %v368_v7 }
 0x49b   :  { %v375_v4 = vpop.permute.xlu1 %374 }
 0x49c   :  { %v377_v5 = vmul.f32 %v375_v4, %v371_v3 }
 0x49e   :  { %379 = vrot.lane.b32.xlu1 %v377_v5, %s1883_s7 }
 0x510   :  { %v380_v9 = vpop.permute.xlu1 %379 }
 0x511   :  { %v382_v10 = vadd.f32 %v380_v9, %v372_v8 }
 0x513   :  { %1824 = vtanh.f32 %v382_v10 }
 0x520   :  { %v1825_v11 = vpop.eup %1824 }
 0x521   :  { %385 = vrot.lane.b32.xlu0 %v1825_v11, %s1882_s30 }
 0x593   :  { %v386_v12 = vpop.permute.xlu0 %385 }
 0x594   :  { %v388_v14 = vmul.f32 %v386_v12, %v371_v3  ;;  %v523_v3 = vsel %vm283_vm6, %v521_v2, %v2093_v59 }
 0x596   :  { %394 = vrot.lane.b32.xlu1 %v388_v14, %s1882_s30  ;;  %v397_v18 = vrot.slane %v388_v14, 2 }
 0x598   :  { %398 = vrot.lane.b32.xlu0 %v397_v18, %s1884_s13 }
 0x59a   :  { %390 = vrot.lane.b32.xlu1 %v388_v14, %s1883_s7 }
 0x608   :  { %v395_v21 = vpop.permute.xlu1 %394 }
 0x609   :  { %v401_v22 = vsel %vm51_vm1, 0.0, %v395_v21 }
 0x60a   :  { %v399_v23 = vpop.permute.xlu0 %398 }
 0x60b   :  { %v402_v25 = vsel %vm278_vm4, %v401_v22, %v399_v23 }
 0x60c   :  { %v404_v27 = vrot.slane %v402_v25, 6  ;;  %v391_v28 = vpop.permute.xlu1 %390 }
 0x60d   :  { %v393_v29 = vsel %vm51_vm1, %v391_v28, 0.0 }
 0x60e   :  { %v406_v30 = vsel %vm283_vm6, %v393_v29, %v404_v27 }
 0x60f   :  { %1606 = vmatmul.mubr.msk.f32.vlgmr.msra.gmra.mxu1 %vm289_vm5, %v406_v30 }
 0x610   :  { %1636 = vmatpush3.msra.mxu1 %v1982_v36  ;;  %1659 = vmatprep.mubr.msk.f32.mxu1 %vm1881_vm0, %v1880_v1 }
 0x611   :  { %1637 = vmatprep.subr.mxu1 %v1880_v1 }
 0x612   :  { %1638 = vmatpush3.msra.mxu1 %v1984_v37 }
 0x613   :  { %1639 = vmatprep.subr.mxu1 %v1880_v1 }
 0x614   :  { %1640 = vmatpush3.msra.mxu1 %v1989_v39 }
 0x615   :  { %1641 = vmatprep.subr.mxu1 %v1880_v1 }
 0x616   :  { %1642 = vmatpush3.msra.mxu1 %v1998_v41 }
 0x617   :  { %1643 = vmatprep.subr.mxu1 %v1880_v1 }
 0x618   :  { %1644 = vmatpush3.msra.mxu1 %v2004_v42 }
 0x619   :  { %1645 = vmatprep.subr.mxu1 %v1880_v1 }
 0x61a   :  { %1646 = vmatpush3.msra.mxu1 %v2010_v43 }
 0x61b   :  { %1647 = vmatprep.subr.mxu1 %v1880_v1 }
 0x61c   :  { %1648 = vmatpush3.msra.mxu1 %v2016_v44 }
 0x61d   :  { %1649 = vmatprep.subr.mxu1 %v1880_v1 }
 0x61e   :  { %1650 = vmatpush3.msra.mxu1 %v2022_v45 }
 0x61f   :  { %1651 = vmatprep.subr.mxu1 %v1880_v1 }
 0x620   :  { %1652 = vmatpush3.msra.mxu1 %v1925_v13 }
 0x621   :  { %1653 = vmatprep.subr.mxu1 %v1880_v1 }
 0x622   :  { %1654 = vmatpush3.msra.mxu1 %v1929_v15 }
 0x623   :  { %1655 = vmatprep.subr.mxu1 %v1880_v1 }
 0x624   :  { %1656 = vmatpush3.msra.mxu1 %v1935_v16 }
 0x625   :  { %1657 = vmatprep.subr.mxu1 %v1880_v1 }
 0x626   :  { %1658 = vmatpush3.msra.mxu1 %v1939_v17 }
 0x627   :  { %1689 = vmatprep.subr.mxu1 %v1880_v1 }
 0x6cf   :  { %v479_v33 = vpop.f32.mrf.mxu1 }
 0x6d0   :  { %v480_v34 = vadd.f32 %v479_v33, %v409_v32 }
 0x6d1   :  { %v1607_v35 = vpop.f32.mrf.mxu1 }
 0x6d2   :  { %1826 = vtanh.f32 %v480_v34  ;;  %v635_v34 = vsel %vm283_vm6, %v1951_v19, %v2093_v59 }
 0x6df   :  { %v1827_v38 = vpop.eup %1826 }
 0x6e0   :  { %v484_v40 = vmul.f32 %v1827_v38, %v1959_v24 }
 0x6e2   :  { %v485_v46 = vadd.f32 %v1964_v26, %v484_v40 }
 0x6e4   :  { %488 = vrot.lane.b32.xlu0 %v485_v46, %s1882_s30  ;;  %v486_v49 = vmul.f32 %v485_v46, %v382_v10 }
 0x756   :  { %v489_v47 = vpop.permute.xlu0 %488 }
 0x757   :  { %v491_v48 = vmul.f32 %v489_v47, %v485_v46 }
 0x759   :  { %493 = vrot.lane.b32.xlu1 %v491_v48, %s1883_s7 }
 0x7cb   :  { %v494_v50 = vpop.permute.xlu1 %493 }
 0x7cc   :  { %v496_v51 = vadd.f32 %v494_v50, %v486_v49 }
 0x7ce   :  { %1828 = vtanh.f32 %v496_v51 }
 0x7db   :  { %v1829_v52 = vpop.eup %1828 }
 0x7dc   :  { %499 = vrot.lane.b32.xlu0 %v1829_v52, %s1882_s30 }
 0x84e   :  { %v500_v53 = vpop.permute.xlu0 %499 }
 0x84f   :  { %v502_v54 = vmul.f32 %v500_v53, %v485_v46 }
 0x851   :  { %508 = vrot.lane.b32.xlu1 %v502_v54, %s1882_s30  ;;  %v511_v55 = vrot.slane %v502_v54, 2 }
 0x853   :  { %512 = vrot.lane.b32.xlu0 %v511_v55, %s1884_s13 }
 0x855   :  { %504 = vrot.lane.b32.xlu1 %v502_v54, %s1883_s7 }
 0x8c3   :  { %v509_v56 = vpop.permute.xlu1 %508 }
 0x8c4   :  { %v515_v57 = vsel %vm51_vm1, 0.0, %v509_v56 }
 0x8c5   :  { %v513_v58 = vpop.permute.xlu0 %512 }
 0x8c6   :  { %v516_v60 = vsel %vm278_vm4, %v515_v57, %v513_v58 }
 0x8c7   :  { %v518_v61 = vrot.slane %v516_v60, 6  ;;  %v505_v62 = vpop.permute.xlu1 %504 }
 0x8c8   :  { %v507_v63 = vsel %vm51_vm1, %v505_v62, 0.0 }
 0x8c9   :  { %v520_v0 = vsel %vm283_vm6, %v507_v63, %v518_v61 }
 0x8ca   :  { %1633 = vmatmul.mubr.msk.f32.vlgmr.msra.gmra.mxu0 %vm289_vm5, %v520_v0 }
 0x8cb   :  { %1663 = vmatpush3.msra.mxu0 %v1982_v36  ;;  %1686 = vmatprep.mubr.msk.f32.mxu0 %vm1881_vm0, %v1880_v1 }
 0x8cc   :  { %1664 = vmatprep.subr.mxu0 %v1880_v1 }
 0x8cd   :  { %1665 = vmatpush3.msra.mxu0 %v1984_v37 }
 0x8ce   :  { %1666 = vmatprep.subr.mxu0 %v1880_v1 }
 0x8cf   :  { %1667 = vmatpush3.msra.mxu0 %v1989_v39 }
 0x8d0   :  { %1668 = vmatprep.subr.mxu0 %v1880_v1 }
 0x8d1   :  { %1669 = vmatpush3.msra.mxu0 %v1998_v41 }
 0x8d2   :  { %1670 = vmatprep.subr.mxu0 %v1880_v1 }
 0x8d3   :  { %1671 = vmatpush3.msra.mxu0 %v2004_v42 }
 0x8d4   :  { %1672 = vmatprep.subr.mxu0 %v1880_v1 }
 0x8d5   :  { %1673 = vmatpush3.msra.mxu0 %v2010_v43 }
 0x8d6   :  { %1674 = vmatprep.subr.mxu0 %v1880_v1 }
 0x8d7   :  { %1675 = vmatpush3.msra.mxu0 %v2016_v44 }
 0x8d8   :  { %1676 = vmatprep.subr.mxu0 %v1880_v1 }
 0x8d9   :  { %1677 = vmatpush3.msra.mxu0 %v2022_v45 }
 0x8da   :  { %1678 = vmatprep.subr.mxu0 %v1880_v1 }
 0x8db   :  { %1679 = vmatpush3.msra.mxu0 %v1925_v13 }
 0x8dc   :  { %1680 = vmatprep.subr.mxu0 %v1880_v1 }
 0x8dd   :  { %1681 = vmatpush3.msra.mxu0 %v1929_v15 }
 0x8de   :  { %1682 = vmatprep.subr.mxu0 %v1880_v1 }
 0x8df   :  { %1683 = vmatpush3.msra.mxu0 %v1935_v16 }
 0x8e0   :  { %1684 = vmatprep.subr.mxu0 %v1880_v1 }
 0x8e1   :  { %1685 = vmatpush3.msra.mxu0 %v1939_v17 }
 0x8e2   :  { %1716 = vmatprep.subr.mxu0 %v1880_v1 }
 0x98a   :  { %v593_v4 = vpop.f32.mrf.mxu0 }
 0x98b   :  { %v594_v5 = vadd.f32 %v593_v4, %v523_v3  ;;  %v748_v4 = vrot.slane %v1951_v19, 2 }
 0x98c   :  { %v1634_v6 = vpop.f32.mrf.mxu0 }
 0x98d   :  { %1830 = vtanh.f32 %v594_v5  ;;  %v750_v5 = vsel %vm283_vm6, %v748_v4, %v2093_v59 }
 0x99a   :  { %v1831_v7 = vpop.eup %1830 }
 0x99b   :  { %v598_v8 = vmul.f32 %v1831_v7, %v1959_v24 }
 0x99d   :  { %v599_v9 = vadd.f32 %v1964_v26, %v598_v8 }
 0x99f   :  { %602 = vrot.lane.b32.xlu0 %v599_v9, %s1882_s30  ;;  %v600_v12 = vmul.f32 %v599_v9, %v496_v51 }
 0xa11   :  { %v603_v10 = vpop.permute.xlu0 %602 }
 0xa12   :  { %v605_v11 = vmul.f32 %v603_v10, %v599_v9 }
 0xa14   :  { %607 = vrot.lane.b32.xlu1 %v605_v11, %s1883_s7 }
 0xa86   :  { %v608_v20 = vpop.permute.xlu1 %607 }
 0xa87   :  { %v610_v14 = vadd.f32 %v608_v20, %v600_v12 }
 0xa89   :  { %1832 = vtanh.f32 %v610_v14 }
 0xa96   :  { %v1833_v18 = vpop.eup %1832 }
 0xa97   :  { %613 = vrot.lane.b32.xlu0 %v1833_v18, %s1882_s30 }
 0xb09   :  { %v614_v21 = vpop.permute.xlu0 %613 }
 0xb0a   :  { %v616_v22 = vmul.f32 %v614_v21, %v599_v9 }
 0xb0c   :  { %622 = vrot.lane.b32.xlu1 %v616_v22, %s1882_s30  ;;  %v625_v23 = vrot.slane %v616_v22, 2 }
 0xb0e   :  { %626 = vrot.lane.b32.xlu0 %v625_v23, %s1884_s13 }
 0xb10   :  { %618 = vrot.lane.b32.xlu1 %v616_v22, %s1883_s7 }
 0xb7e   :  { %v623_v25 = vpop.permute.xlu1 %622 }
 0xb7f   :  { %v629_v27 = vsel %vm51_vm1, 0.0, %v623_v25 }
 0xb80   :  { %v627_v28 = vpop.permute.xlu0 %626 }
 0xb81   :  { %v630_v29 = vsel %vm278_vm4, %v629_v27, %v627_v28 }
 0xb82   :  { %v632_v30 = vrot.slane %v630_v29, 6  ;;  %v619_v31 = vpop.permute.xlu1 %618 }
 0xb83   :  { %v621_v32 = vsel %vm51_vm1, %v619_v31, 0.0 }
 0xb84   :  { %v634_v33 = vsel %vm283_vm6, %v621_v32, %v632_v30 }
 0xb85   :  { %1660 = vmatmul.mubr.msk.f32.vlgmr.msra.gmra.mxu1 %vm289_vm5, %v634_v33 }
 0xb86   :  { %1690 = vmatpush3.msra.mxu1 %v1982_v36  ;;  %1713 = vmatprep.mubr.msk.f32.mxu1 %vm1881_vm0, %v1880_v1 }
 0xb87   :  { %1691 = vmatprep.subr.mxu1 %v1880_v1 }
 0xb88   :  { %1692 = vmatpush3.msra.mxu1 %v1984_v37 }
 0xb89   :  { %1693 = vmatprep.subr.mxu1 %v1880_v1 }
 0xb8a   :  { %1694 = vmatpush3.msra.mxu1 %v1989_v39 }
 0xb8b   :  { %1695 = vmatprep.subr.mxu1 %v1880_v1 }
 0xb8c   :  { %1696 = vmatpush3.msra.mxu1 %v1998_v41 }
 0xb8d   :  { %1697 = vmatprep.subr.mxu1 %v1880_v1 }
 0xb8e   :  { %1698 = vmatpush3.msra.mxu1 %v2004_v42 }
 0xb8f   :  { %1699 = vmatprep.subr.mxu1 %v1880_v1 }
 0xb90   :  { %1700 = vmatpush3.msra.mxu1 %v2010_v43 }
 0xb91   :  { %1701 = vmatprep.subr.mxu1 %v1880_v1 }
 0xb92   :  { %1702 = vmatpush3.msra.mxu1 %v2016_v44 }
 0xb93   :  { %1703 = vmatprep.subr.mxu1 %v1880_v1 }
 0xb94   :  { %1704 = vmatpush3.msra.mxu1 %v2022_v45 }
 0xb95   :  { %1705 = vmatprep.subr.mxu1 %v1880_v1 }
 0xb96   :  { %1706 = vmatpush3.msra.mxu1 %v1925_v13 }
 0xb97   :  { %1707 = vmatprep.subr.mxu1 %v1880_v1 }
 0xb98   :  { %1708 = vmatpush3.msra.mxu1 %v1929_v15 }
 0xb99   :  { %1709 = vmatprep.subr.mxu1 %v1880_v1 }
 0xb9a   :  { %1710 = vmatpush3.msra.mxu1 %v1935_v16 }
 0xb9b   :  { %1711 = vmatprep.subr.mxu1 %v1880_v1 }
 0xb9c   :  { %1712 = vmatpush3.msra.mxu1 %v1939_v17 }
 0xb9d   :  { %1743 = vmatprep.subr.mxu1 %v1880_v1 }
 0xc45   :  { %v705_v35 = vpop.f32.mrf.mxu1 }
 0xc46   :  { %v706_v38 = vadd.f32 %v705_v35, %v635_v34 }
 0xc47   :  { %v1661_v40 = vpop.f32.mrf.mxu1 }
 0xc48   :  { %1834 = vtanh.f32 %v706_v38 }
 0xc55   :  { %v1835_v46 = vpop.eup %1834 }
 0xc56   :  { %v710_v47 = vmul.f32 %v1835_v46, %v1959_v24 }
 0xc58   :  { %v711_v48 = vadd.f32 %v1964_v26, %v710_v47 }
 0xc5a   :  { %714 = vrot.lane.b32.xlu0 %v711_v48, %s1882_s30  ;;  %v712_v51 = vmul.f32 %v711_v48, %v610_v14 }
 0xccc   :  { %v715_v49 = vpop.permute.xlu0 %714 }
 0xccd   :  { %v717_v50 = vmul.f32 %v715_v49, %v711_v48 }
 0xccf   :  { %719 = vrot.lane.b32.xlu1 %v717_v50, %s1883_s7 }
 0xd41   :  { %v720_v52 = vpop.permute.xlu1 %719 }
 0xd42   :  { %v722_v53 = vadd.f32 %v720_v52, %v712_v51 }
 0xd44   :  { %1836 = vtanh.f32 %v722_v53 }
 0xd51   :  { %v1837_v54 = vpop.eup %1836 }
 0xd52   :  { %725 = vrot.lane.b32.xlu0 %v1837_v54, %s1882_s30 }
 0xdc4   :  { %v726_v55 = vpop.permute.xlu0 %725 }
 0xdc5   :  { %v728_v56 = vmul.f32 %v726_v55, %v711_v48 }
 0xdc7   :  { %734 = vrot.lane.b32.xlu1 %v728_v56, %s1882_s30  ;;  %v737_v57 = vrot.slane %v728_v56, 2 }
 0xdc9   :  { %738 = vrot.lane.b32.xlu0 %v737_v57, %s1884_s13  ;;  %v976_v57 = vrot.slane %v1951_v19, 6 }
 0xdcb   :  { %730 = vrot.lane.b32.xlu1 %v728_v56, %s1883_s7 }
 0xe39   :  { %v735_v58 = vpop.permute.xlu1 %734 }
 0xe3a   :  { %v741_v60 = vsel %vm51_vm1, 0.0, %v735_v58  ;;  %v978_v58 = vsel %vm283_vm6, %v976_v57, %v2093_v59  ;;  %v1398_v57 = vld [vmem:[%s2383_s2 + $0x4] ss:$0 sm:$0xff] }
 0xe3b   :  { %v739_v61 = vpop.permute.xlu0 %738 }
 0xe3c   :  { %v742_v62 = vsel %vm278_vm4, %v741_v60, %v739_v61 }
 0xe3d   :  { %v744_v63 = vrot.slane %v742_v62, 6  ;;  %v731_v0 = vpop.permute.xlu1 %730 }
 0xe3e   :  { %v733_v2 = vsel %vm51_vm1, %v731_v0, 0.0 }
 0xe3f   :  { %v746_v3 = vsel %vm283_vm6, %v733_v2, %v744_v63 }
 0xe40   :  { %1687 = vmatmul.mubr.msk.f32.vlgmr.msra.gmra.mxu0 %vm289_vm5, %v746_v3 }
 0xe41   :  { %1717 = vmatpush3.msra.mxu0 %v1982_v36  ;;  %1740 = vmatprep.mubr.msk.f32.mxu0 %vm1881_vm0, %v1880_v1 }
 0xe42   :  { %1718 = vmatprep.subr.mxu0 %v1880_v1 }
 0xe43   :  { %1719 = vmatpush3.msra.mxu0 %v1984_v37 }
 0xe44   :  { %1720 = vmatprep.subr.mxu0 %v1880_v1 }
 0xe45   :  { %1721 = vmatpush3.msra.mxu0 %v1989_v39 }
 0xe46   :  { %1722 = vmatprep.subr.mxu0 %v1880_v1 }
 0xe47   :  { %1723 = vmatpush3.msra.mxu0 %v1998_v41 }
 0xe48   :  { %1724 = vmatprep.subr.mxu0 %v1880_v1 }
 0xe49   :  { %1725 = vmatpush3.msra.mxu0 %v2004_v42 }
 0xe4a   :  { %1726 = vmatprep.subr.mxu0 %v1880_v1 }
 0xe4b   :  { %1727 = vmatpush3.msra.mxu0 %v2010_v43 }
 0xe4c   :  { %1728 = vmatprep.subr.mxu0 %v1880_v1 }
 0xe4d   :  { %1729 = vmatpush3.msra.mxu0 %v2016_v44 }
 0xe4e   :  { %1730 = vmatprep.subr.mxu0 %v1880_v1 }
 0xe4f   :  { %1731 = vmatpush3.msra.mxu0 %v2022_v45 }
 0xe50   :  { %1732 = vmatprep.subr.mxu0 %v1880_v1 }
 0xe51   :  { %1733 = vmatpush3.msra.mxu0 %v1925_v13 }
 0xe52   :  { %1734 = vmatprep.subr.mxu0 %v1880_v1 }
 0xe53   :  { %1735 = vmatpush3.msra.mxu0 %v1929_v15 }
 0xe54   :  { %1736 = vmatprep.subr.mxu0 %v1880_v1 }
 0xe55   :  { %1737 = vmatpush3.msra.mxu0 %v1935_v16 }
 0xe56   :  { %1738 = vmatprep.subr.mxu0 %v1880_v1 }
 0xe57   :  { %1739 = vmatpush3.msra.mxu0 %v1939_v17 }
 0xe58   :  { %1773 = vmatprep.subr.mxu0 %v1880_v1 }
 0xf00   :  { %v820_v13 = vpop.f32.mrf.mxu0 }
 0xf01   :  { %v821_v6 = vadd.f32 %v820_v13, %v750_v5 }
 0xf02   :  { %v1688_v7 = vpop.f32.mrf.mxu0 }
 0xf03   :  { %1838 = vtanh.f32 %v821_v6 }
 0xf10   :  { %v1839_v15 = vpop.eup %1838 }
 0xf11   :  { %v825_v8 = vmul.f32 %v1839_v15, %v1959_v24 }
 0xf13   :  { %v826_v16 = vadd.f32 %v1964_v26, %v825_v8 }
 0xf15   :  { %829 = vrot.lane.b32.xlu0 %v826_v16, %s1882_s30  ;;  %v827_v10 = vmul.f32 %v826_v16, %v722_v53 }
 0xf87   :  { %v830_v9 = vpop.permute.xlu0 %829 }
 0xf88   :  { %v832_v17 = vmul.f32 %v830_v9, %v826_v16 }
 0xf8a   :  { %834 = vrot.lane.b32.xlu1 %v832_v17, %s1883_s7 }
 0xffc   :  { %v835_v11 = vpop.permute.xlu1 %834 }
 0xffd   :  { %v837_v12 = vadd.f32 %v835_v11, %v827_v10 }
 0xfff   :  { %1840 = vtanh.f32 %v837_v12 }
0x100c   :  { %v1841_v20 = vpop.eup %1840 }
0x100d   :  { %840 = vrot.lane.b32.xlu0 %v1841_v20, %s1882_s30 }
0x107f   :  { %v841_v14 = vpop.permute.xlu0 %840 }
0x1080   :  { %v843_v18 = vmul.f32 %v841_v14, %v826_v16 }
0x1082   :  { %849 = vrot.lane.b32.xlu1 %v843_v18, %s1882_s30  ;;  %v852_v21 = vrot.slane %v843_v18, 2 }
0x1084   :  { %853 = vrot.lane.b32.xlu0 %v852_v21, %s1884_s13 }
0x1086   :  { %845 = vrot.lane.b32.xlu1 %v843_v18, %s1883_s7 }
0x10f4   :  { %v850_v22 = vpop.permute.xlu1 %849 }
0x10f5   :  { %v856_v23 = vsel %vm51_vm1, 0.0, %v850_v22 }
0x10f6   :  { %v854_v25 = vpop.permute.xlu0 %853 }
0x10f7   :  { %v857_v27 = vsel %vm278_vm4, %v856_v23, %v854_v25 }
0x10f8   :  { %v859_v28 = vrot.slane %v857_v27, 6  ;;  %v846_v29 = vpop.permute.xlu1 %845 }
0x10f9   :  { %v848_v30 = vsel %vm51_vm1, %v846_v29, 0.0  ;;  %v1180_v29 = vld [vmem:[#allocation2 + $0x90] sm:$0xff] }
0x10fa   :  { %v861_v31 = vsel %vm283_vm6, %v848_v30, %v859_v28  ;;  %v1178_v30 = vld [vmem:[#allocation2 + $0x80] sm:$0xff] }
0x10fb   :  { %1714 = vmatmul.mubr.msk.f32.vlgmr.msra.gmra.mxu1 %vm289_vm5, %v861_v31  ;;  %v1277_v31 = vld [vmem:[#allocation2 + $0x118] sm:$0xff] }
0x10fc   :  { %1744 = vmatpush3.msra.mxu1 %v1982_v36  ;;  %1759 = vmatprep.mubr.msk.f32.mxu1 %vm1881_vm0, %v1880_v1  ;;  %v862_v36 = vrot.slane %v1951_v19, 4 }
0x10fd   :  { %1745 = vmatprep.subr.mxu1 %v1880_v1 }
0x10fe   :  { %1746 = vmatpush3.msra.mxu1 %v1984_v37  ;;  %v864_v37 = vsel %vm283_vm6, %v862_v36, %v2093_v59  ;;  %v1276_v36 = vld [vmem:[#allocation2 + $0x110] sm:$0xff] }
0x10ff   :  { %1747 = vmatprep.subr.mxu1 %v1880_v1 }
0x1100   :  { %1748 = vmatpush3.msra.mxu1 %v1989_v39 }
0x1101   :  { %1749 = vmatprep.subr.mxu1 %v1880_v1 }
0x1102   :  { %1750 = vmatpush3.msra.mxu1 %v1998_v41 }
0x1103   :  { %1751 = vmatprep.subr.mxu1 %v1880_v1 }
0x1104   :  { %1752 = vmatpush3.msra.mxu1 %v2004_v42 }
0x1105   :  { %1753 = vmatprep.subr.mxu1 %v1880_v1 }
0x1106   :  { %1754 = vmatpush3.msra.mxu1 %v2010_v43 }
0x1107   :  { %1755 = vmatprep.subr.mxu1 %v1880_v1 }
0x1108   :  { %1756 = vmatpush3.msra.mxu1 %v2016_v44 }
0x1109   :  { %1757 = vmatprep.subr.mxu1 %v1880_v1 }
0x110a   :  { %1758 = vmatpush3.msra.mxu1 %v2022_v45 }
0x110b   :  { %1762 = vmatprep.subr.mxu1 %v1880_v1 }
0x11bb   :  { %v934_v39 = vpop.f32.mrf.mxu1 }
0x11bc   :  { %v935_v41 = vadd.f32 %v934_v39, %v864_v37  ;;  %v1275_v37 = vld [vmem:[#allocation2 + $0x108] sm:$0xff] }
0x11bd   :  { %v1715_v42 = vpop.f32.mrf.mxu1 }
0x11be   :  { %1842 = vtanh.f32 %v935_v41  ;;  %v1274_v42 = vld [vmem:[#allocation2 + $0x100] sm:$0xff] }
0x11cb   :  { %v1843_v43 = vpop.eup %1842 }
0x11cc   :  { %v939_v32 = vmul.f32 %v1843_v43, %v1959_v24 }
0x11ce   :  { %v940_v44 = vadd.f32 %v1964_v26, %v939_v32  ;;  %v1273_v32 = vld [vmem:[#allocation2 + $0xf8] sm:$0xff] }
0x11d0   :  { %943 = vrot.lane.b32.xlu0 %v940_v44, %s1882_s30  ;;  %v941_v34 = vmul.f32 %v940_v44, %v837_v12 }
0x1242   :  { %v944_v33 = vpop.permute.xlu0 %943 }
0x1243   :  { %v946_v45 = vmul.f32 %v944_v33, %v940_v44  ;;  %v1271_v33 = vld [vmem:[#allocation2 + $0xe8] sm:$0xff] }
0x1245   :  { %948 = vrot.lane.b32.xlu1 %v946_v45, %s1883_s7  ;;  %v1270_v45 = vld [vmem:[#allocation2 + $0xe0] sm:$0xff] }
0x12b7   :  { %v949_v35 = vpop.permute.xlu1 %948 }
0x12b8   :  { %v951_v38 = vadd.f32 %v949_v35, %v941_v34  ;;  %v1269_v34 = vld [vmem:[#allocation2 + $0xd8] sm:$0xff]  ;;  %v1268_v35 = vld [vmem:[#allocation2 + $0xd0] sm:$0xff] }
0x12ba   :  { %1844 = vtanh.f32 %v951_v38 }
0x12c7   :  { %v1845_v40 = vpop.eup %1844 }
0x12c8   :  { %954 = vrot.lane.b32.xlu0 %v1845_v40, %s1882_s30  ;;  %v1266_v40 = vld [vmem:[#allocation2 + $0xc0] sm:$0xff] }
0x133a   :  { %v955_v46 = vpop.permute.xlu0 %954 }
0x133b   :  { %v957_v47 = vmul.f32 %v955_v46, %v940_v44  ;;  %v1272_v44 = vld [vmem:[#allocation2 + $0xf0] sm:$0xff]  ;;  %v1265_v46 = vld [vmem:[#allocation2 + $0xb8] sm:$0xff] }
0x133d   :  { %963 = vrot.lane.b32.xlu1 %v957_v47, %s1882_s30  ;;  %v966_v48 = vrot.slane %v957_v47, 2 }
0x133f   :  { %967 = vrot.lane.b32.xlu0 %v966_v48, %s1884_s13 }
0x1341   :  { %959 = vrot.lane.b32.xlu1 %v957_v47, %s1883_s7  ;;  %v1264_v47 = vld [vmem:[#allocation2 + $0xb0] sm:$0xff] }
0x13af   :  { %v964_v49 = vpop.permute.xlu1 %963 }
0x13b0   :  { %v970_v50 = vsel %vm51_vm1, 0.0, %v964_v49  ;;  %v1263_v49 = vld [vmem:[#allocation2 + $0xa8] sm:$0xff] }
0x13b1   :  { %v968_v51 = vpop.permute.xlu0 %967 }
0x13b2   :  { %v971_v52 = vsel %vm278_vm4, %v970_v50, %v968_v51  ;;  %v1262_v50 = vld [vmem:[#allocation2 + $0xa0] sm:$0xff] }
0x13b3   :  { %v973_v53 = vrot.slane %v971_v52, 6  ;;  %v960_v54 = vpop.permute.xlu1 %959  ;;  %v1396_v51 = vld [vmem:[%s2383_s2 + $0x3] ss:$0 sm:$0xff] }
0x13b4   :  { %v962_v55 = vsel %vm51_vm1, %v960_v54, 0.0 }
0x13b5   :  { %v975_v56 = vsel %vm283_vm6, %v962_v55, %v973_v53 }
0x13b6   :  { %1741 = vmatmul.mubr.msk.f32.vlgmr.msra.gmra.mxu0 %vm289_vm5, %v975_v56 }
0x13b7   :  { %1805 = vmatprep.mubr.msk.f32.mxu0 %vm1881_vm0, %v1880_v1  ;;  %1774 = vmatpush3.msra.mxu0 %v1277_v31 }
0x13b8   :  { %1775 = vmatprep.subr.mxu0 %v1880_v1 }
0x13b9   :  { %1776 = vmatpush3.msra.mxu0 %v1276_v36 }
0x13ba   :  { %1777 = vmatprep.subr.mxu0 %v1880_v1 }
0x13bb   :  { %1778 = vmatpush3.msra.mxu0 %v1275_v37 }
0x13bc   :  { %1779 = vmatprep.subr.mxu0 %v1880_v1 }
0x13bd   :  { %1780 = vmatpush3.msra.mxu0 %v1274_v42 }
0x13be   :  { %1781 = vmatprep.subr.mxu0 %v1880_v1 }
0x13bf   :  { %1782 = vmatpush3.msra.mxu0 %v1273_v32 }
0x13c0   :  { %1783 = vmatprep.subr.mxu0 %v1880_v1 }
0x13c1   :  { %1784 = vmatpush3.msra.mxu0 %v1272_v44 }
0x13c2   :  { %1785 = vmatprep.subr.mxu0 %v1880_v1 }
0x13c3   :  { %1786 = vmatpush3.msra.mxu0 %v1271_v33 }
0x13c4   :  { %1787 = vmatprep.subr.mxu0 %v1880_v1 }
0x13c5   :  { %1788 = vmatpush3.msra.mxu0 %v1270_v45 }
0x13c6   :  { %1789 = vmatprep.subr.mxu0 %v1880_v1 }
0x13c7   :  { %1790 = vmatpush3.msra.mxu0 %v1269_v34 }
0x13c8   :  { %1791 = vmatprep.subr.mxu0 %v1880_v1 }
0x13c9   :  { %1792 = vmatpush3.msra.mxu0 %v1268_v35 }
0x13ca   :  { %1793 = vmatprep.subr.mxu0 %v1880_v1 }
0x1476   :  { %v1048_v60 = vpop.f32.mrf.mxu0 }
0x1477   :  { %v1049_v61 = vadd.f32 %v1048_v60, %v978_v58 }
0x1478   :  { %v1742_v62 = vpop.f32.mrf.mxu0 }
0x1479   :  { %1846 = vtanh.f32 %v1049_v61 }
0x1486   :  { %v1847_v63 = vpop.eup %1846 }
0x1487   :  { %v1053_v0 = vmul.f32 %v1847_v63, %v1959_v24 }
0x1489   :  { %v1054_v2 = vadd.f32 %v1964_v26, %v1053_v0 }
0x148b   :  { %1057 = vrot.lane.b32.xlu0 %v1054_v2, %s1882_s30  ;;  %v1055_v5 = vmul.f32 %v1054_v2, %v951_v38  ;;  %v1267_v38 = vld [vmem:[#allocation2 + $0xc8] sm:$0xff] }
0x148c   :  { %1794 = vmatpush3.msra.mxu0 %v1267_v38 }
0x148d   :  { %1795 = vmatprep.subr.mxu0 %v1880_v1 }
0x148e   :  { %1796 = vmatpush3.msra.mxu0 %v1266_v40 }
0x148f   :  { %1797 = vmatprep.subr.mxu0 %v1880_v1 }
0x1490   :  { %1798 = vmatpush3.msra.mxu0 %v1265_v46 }
0x1491   :  { %1799 = vmatprep.subr.mxu0 %v1880_v1 }
0x1492   :  { %1800 = vmatpush3.msra.mxu0 %v1264_v47 }
0x1493   :  { %1801 = vmatprep.subr.mxu0 %v1880_v1 }
0x1494   :  { %1802 = vmatpush3.msra.mxu0 %v1263_v49 }
0x1495   :  { %1803 = vmatprep.subr.mxu0 %v1880_v1 }
0x1496   :  { %1804 = vmatpush3.msra.mxu0 %v1262_v50 }
0x14fd   :  { %v1058_v3 = vpop.permute.xlu0 %1057 }
0x14fe   :  { %v1060_v4 = vmul.f32 %v1058_v3, %v1054_v2 }
0x1500   :  { %1062 = vrot.lane.b32.xlu1 %v1060_v4, %s1883_s7 }
0x1572   :  { %v1063_v19 = vpop.permute.xlu1 %1062 }
0x1573   :  { %v2323_v13 = vadd.f32 %v1063_v19, %v1055_v5 }
0x1575   :  { %1848 = vtanh.f32 %v2323_v13  ;;  %v1158_v23 = vrot.slane %v2323_v13, 2 }
0x1582   :  { %v1849_v6 = vpop.eup %1848 }
0x1583   :  { %1068 = vrot.lane.b32.xlu0 %v1849_v6, %s1882_s30 }
0x15f5   :  { %v1069_v7 = vpop.permute.xlu0 %1068 }
0x15f6   :  { %v1071_v15 = vmul.f32 %v1069_v7, %v1054_v2 }
0x15f8   :  { %v1076_v8 = vrot.slane %v1071_v15, 2  ;;  %1073 = vrot.lane.b32.xlu1 %v1071_v15, %s1883_s7 }
0x15fa   :  { %1077 = vrot.lane.b32.xlu0 %v1076_v8, %s1882_s30 }
0x166a   :  { %v2329_v16 = vpop.permute.xlu1 %1073 }
0x166c   :  { %v1078_v9 = vpop.permute.xlu0 %1077 }
0x166d   :  { %v1080_v17 = vsel %vm51_vm1, %v2329_v16, %v1078_v9 }
0x166e   :  { %1760 = vmatmul.mubr.msk.f32.vlgmr.msra.gmra.mxu1 %vm278_vm4, %v1080_v17 }
0x166f   :  { %1770 = vmatprep.mubr.msk.f32.mxu1 %vm1881_vm0, %v1880_v1 }
0x172e   :  { %v1150_v10 = vpop.f32.mrf.mxu1 }
0x172f   :  { %v1151_v11 = vadd.f32 %v2093_v59, %v1150_v10  ;;  %v1181_v59 = vld [vmem:[#allocation2 + $0x98] sm:$0xff] }
0x1730   :  { %v1761_v12 = vpop.f32.mrf.mxu1  ;;  %1763 = vmatpush3.msra.mxu1 %v1181_v59 }
0x1731   :  { %1850 = vtanh.f32 %v1151_v11  ;;  %1764 = vmatprep.subr.mxu1 %v1880_v1 }
0x1732   :  { %1765 = vmatpush3.msra.mxu1 %v1180_v29 }
0x1733   :  { %1766 = vmatprep.subr.mxu1 %v1880_v1 }
0x173e   :  { %v1851_v20 = vpop.eup %1850 }
0x173f   :  { %v1155_v14 = vmul.f32 %v1851_v20, %v1959_v24  ;;  %v1179_v24 = vld [vmem:[#allocation2 + $0x88] sm:$0xff] }
0x1740   :  { %1767 = vmatpush3.msra.mxu1 %v1179_v24 }
0x1741   :  { %v1156_v18 = vadd.f32 %v1964_v26, %v1155_v14  ;;  %1768 = vmatprep.subr.mxu1 %v1880_v1 }
0x1742   :  { %1769 = vmatpush3.msra.mxu1 %v1178_v30 }
0x1743   :  { %1162 = vrot.lane.b32.xlu1 %v1156_v18, %s1882_s30  ;;  %v1160_v25 = vmul.f32 %v1158_v23, %v1156_v18 }
0x17b5   :  { %v1163_v21 = vpop.permute.xlu1 %1162 }
0x17b6   :  { %v1165_v22 = vmul.f32 %v1163_v21, %v1156_v18 }
0x17b8   :  { %1167 = vrot.lane.b32.xlu0 %v1165_v22, %s1883_s7 }
0x182a   :  { %v1168_v27 = vpop.permute.xlu0 %1167 }
0x182b   :  { %v1170_v28 = vadd.f32 %v1168_v27, %v1160_v25 }
0x182d   :  { %1852 = vtanh.f32 %v1170_v28 }
0x183a   :  { %v1853_v26 = vpop.eup %1852 }
0x183b   :  { %1173 = vrot.lane.b32.xlu1 %v1853_v26, %s1882_s30 }
0x18ad   :  { %v1174_v39 = vpop.permute.xlu1 %1173 }
0x18ae   :  { %v1176_v41 = vmul.f32 %v1174_v39, %v1156_v18 }
0x18b0   :  { %v1177_v43 = vmax.f32 %v1176_v41, 0.0  ;;  %1354 = vrot.lane.b32.xlu1 %v1176_v41, %s1882_s30 }
0x18b2   :  { %1188 = vrot.lane.b32.xlu0 %v1177_v43, %s1883_s7 }
0x18b4   :  { %1361 = vrot.lane.b32.xlu1 %v1170_v28, %s1882_s30 }
0x18b6   :  { %1357 = vrot.lane.b32.xlu0 %v2323_v13, %s1883_s7 }
0x1922   :  { %v1355_v55 = vpop.permute.xlu1 %1354 }
0x1923   :  { %v1364_v58 = vsel %vm51_vm1, %v2329_v16, %v1355_v55 }
0x1924   :  { %v1189_v48 = vpop.permute.xlu0 %1188 }
0x1925   :  { %1771 = vmatmul.mubr.msk.f32.vlgmr.msra.gmra.mxu1 %vm51_vm1, %v1189_v48 }
0x1926   :  { %v1362_v63 = vpop.permute.xlu1 %1361 }
0x1928   :  { %v1358_v56 = vpop.permute.xlu0 %1357 }
0x1929   :  { %v1365_v60 = vsel %vm278_vm4, %v1364_v58, %v1358_v56 }
0x192a   :  { %v1366_v2 = vsel %vm289_vm5, %v1365_v60, %v1362_v63 }
0x19e5   :  { %v1258_v52 = vpop.f32.mrf.mxu1 }
0x19e6   :  { %v1259_v53 = vadd.f32 %v1396_v51, %v1258_v52 }
0x19e7   :  { %v1772_v54 = vpop.f32.mrf.mxu1 }
0x19e8   :  { %1806 = vmatmul.mubr.f32.vlgmr.msra.gmra.mxu0 %v1259_v53 }
0x1aa8   :  { %v1349_v1 = vpop.f32.mrf.mxu0 }
0x1aa9   :  { %v1350_v61 = vadd.f32 %v1398_v57, %v1349_v1 }
0x1aaa   :  { %v1807_v62 = vpop.f32.mrf.mxu0 }
0x1aab   :  { %v1368_v0 = vrot.slane %v1350_v61, 6 }
0x1aad   :  { %v1370_v3 = vsel %vm283_vm6, %v1366_v2, %v1368_v0 }
0x1aae   :  { %1371 = vst [vmem:[%s2385_s4] sm:$0xf] %v1370_v3 }
0x1aaf   :  { %1376 = vsyncpa [#allocation3], 1 }

</bundles_post_ra>
